<compile_context>
chip_gen: v6e
topology: v6e:2x2x1
jax: 0.10.0
libtpu: 0.0.40
codegen_flags: <defaults>
</compile_context>

<pallas_src>
import functools

import jax
import jax.numpy as jnp
from jax import lax
from jax.experimental import pallas as pl
from jax.experimental.pallas import tpu as pltpu


def _round_up(x, m):
    return (x + m - 1) // m * m


def _cdiv(a, b):
    return -(-a // b)


def _hawkes_kernel(scal_ref, cj_ref, gG_ref, mu_ref, A_ref,
                   lam_ref, Lam_ref, s_ref, *, activation):
    TB, Cp = Lam_ref.shape
    l_step = pl.program_id(1)

    # Single lane iota, shared by both one-hot compares.
    lane = lax.broadcasted_iota(jnp.int32, (1, Cp), 1)              # (1, Cp)

    @pl.when(l_step == 0)
    def _init():
        s_ref[...] = jnp.zeros_like(s_ref)

    # --- history chunk: accumulate S_g / S_G into the stacked scratch -------
    cj = cj_ref[0]                                                  # (TB, LC) int32
    gt = gG_ref[0, 0]                                               # (TB, LC) f32
    Gt = gG_ref[1, 0]                                               # (TB, LC) f32
    m = cj[:, :, None] == lane.reshape(1, 1, Cp)                    # (TB, LC, Cp) bool
    s_ref[0:TB, :] += jnp.sum(jnp.where(m, gt[:, :, None], 0.0), axis=1)
    s_ref[TB:2 * TB, :] += jnp.sum(jnp.where(m, Gt[:, :, None], 0.0), axis=1)

    # --- last history chunk: matmul with A, combine, activate, store --------
    @pl.when(l_step == pl.num_programs(1) - 1)
    def _finalize():
        # One MXU pass for both infectivity matmuls (S_g and S_G row-stacked).
        # If A was shipped as bf16 (v6e/v7x), operands are bf16, accumulation f32.
        SA = jnp.dot(s_ref[...].astype(A_ref.dtype), A_ref[...],
                     preferred_element_type=jnp.float32)            # (2*TB, Cp)

        ci = scal_ref[:, 0:1].astype(jnp.int32)                     # (TB, 1)
        dts = scal_ref[:, 1:2]                                      # (TB, 1)
        mu_all = mu_ref[...]                                        # (1, Cp)

        ci_m = ci == lane                                           # (TB, Cp) bool
        mu = jnp.sum(jnp.where(ci_m, mu_all, 0.0), axis=-1, keepdims=True)
        alpha = jnp.sum(jnp.where(ci_m, SA[0:TB, :], 0.0), axis=-1, keepdims=True)

        lam = mu + alpha                                            # (TB, 1)
        Lam = dts * mu_all + SA[TB:2 * TB, :]                       # (TB, Cp)
        if activation == "relu":
            lam = jnp.maximum(lam, 0.0)
            Lam = jnp.maximum(Lam, 0.0)
        # 'identity' -> no-op.

        Lam_ref[...] = Lam
        lam_ref[...] = jnp.where(lane[:, 0:128] == 0, lam, 0.0)     # lam lives in col 0


def _pallas_forward(scal, cj3, gG, mu_p, A_p, *, TB, activation,
                    single_buffer_consts):
    Bp = scal.shape[0]
    nL, _, LC = cj3.shape
    Cp = A_p.shape[0]

    if single_buffer_consts:
        # Grid-invariant operands only need one VMEM buffer (no double-buffer):
        # saves a full Cp*Cp copy of A (matters against v7x's 64 MiB VMEM).
        def const_spec(shape):
            return pl.BlockSpec(shape, lambda i, l: (0,) * len(shape),
                                pipeline_mode=pl.Buffered(1))
    else:
        def const_spec(shape):
            return pl.BlockSpec(shape, lambda i, l: (0,) * len(shape))

    return pl.pallas_call(
        functools.partial(_hawkes_kernel, activation=activation),
        out_shape=(jax.ShapeDtypeStruct((Bp, 128), jnp.float32),     # lambda_t (col 0)
                   jax.ShapeDtypeStruct((Bp, Cp), jnp.float32)),     # Lambda_T
        grid=(Bp // TB, nL),
        in_specs=[
            pl.BlockSpec((TB, 2), lambda i, l: (i, 0)),              # [ci | dts]
            pl.BlockSpec((1, TB, LC), lambda i, l: (l, i, 0)),       # cj chunk
            pl.BlockSpec((2, 1, TB, LC), lambda i, l: (0, l, i, 0)), # [gt ; Gt] chunk
            const_spec((1, Cp)),                                     # mu_all (padded)
            const_spec((Cp, Cp)),                                    # A (padded)
        ],
        out_specs=[
            pl.BlockSpec((TB, 128), lambda i, l: (i, 0)),
            pl.BlockSpec((TB, Cp), lambda i, l: (i, 0)),
        ],
        scratch_shapes=[pltpu.VMEM((2 * TB, Cp), jnp.float32)],
        compiler_params=pltpu.CompilerParams(
            dimension_semantics=("parallel", "arbitrary"),
            vmem_limit_bytes=64 * 1024 * 1024),
    )(scal, cj3, gG, mu_p, A_p)


def hawkes_process_intensity(ci, cj, dts, gt, Gt, mu_all, A,
                             activation="relu", mxu_dtype=jnp.float32):
    B, L = cj.shape
    C = A.shape[0]

    if activation is None:
        activation = "identity"
    if activation == "softplus":
        # TODO(synk): original softplus branch references undefined self.num_type
        # (a bug in the PoPPy source), so it is not reproduced here.
        raise NotImplementedError("softplus activation not supported")
    if activation not in ("relu", "identity"):
        activation = "identity"   # matches PyTorch fallback (warning + Identity)

    Cp = _round_up(C, 128)        # lane-dense width (no extra C+1 padding)

    # --- batch tiling --------------------------------------------------------
    # Keep (TB, Cp) blocks ~<=1 MiB, cap TB at 256 (v7x-friendly), minimize
    # padding waste, and use >=2 batch tiles when B > 8 so the "parallel"
    # batch axis can shard across both TensorCores.
    tb_cap = max(8, min(256, ((1 << 20) // (Cp * 4)) // 8 * 8))
    n_b = max(1, _cdiv(B, tb_cap))
    if B > 8 and n_b < 2:
        n_b = 2
    TB = _round_up(_cdiv(B, n_b), 8)
    Bp = n_b * TB

    # --- history (L) chunking -------------------------------------------------
    # Chunk L so the per-step (TB, LC, Cp) select/reduce temporaries stay
    # ~<=4 MiB. LC is the (full) last dim of the reshaped history slabs, so any
    # chunk size is layout-legal.
    lc_cap = max(8, ((4 << 20) // (TB * Cp * 4)) // 8 * 8)
    LC = L if L <= lc_cap else lc_cap
    Lp = _round_up(L, LC)
    nL = Lp // LC

    # --- operand packing / padding -------------------------------------------
    scal = jnp.concatenate([ci.reshape(B, 1).astype(jnp.float32),   # exact small ints
                            dts.reshape(B, 1).astype(jnp.float32)], axis=-1)
    cj_i = cj.astype(jnp.int32)
    gt_f = gt.astype(jnp.float32)
    Gt_f = Gt.astype(jnp.float32)
    if Lp != L:
        padl = ((0, 0), (0, Lp - L))
        cj_i, gt_f, Gt_f = (jnp.pad(a, padl) for a in (cj_i, gt_f, Gt_f))
    if Bp != B:
        padb = ((0, Bp - B), (0, 0))
        scal = jnp.pad(scal, padb)
        cj_i, gt_f, Gt_f = (jnp.pad(a, padb) for a in (cj_i, gt_f, Gt_f))

    cj3 = cj_i.reshape(Bp, nL, LC).transpose(1, 0, 2)                # (nL, Bp, LC)
    gG = jnp.stack([gt_f.reshape(Bp, nL, LC).transpose(1, 0, 2),
                    Gt_f.reshape(Bp, nL, LC).transpose(1, 0, 2)],
                   axis=0)                                           # (2, nL, Bp, LC)

    # Zero-pad parameters to the lane-dense width (padding keeps the math exact).
    mu_p = jnp.zeros((1, Cp), jnp.float32).at[:, :C].set(
        mu_all.reshape(1, C).astype(jnp.float32))
    A_p = jnp.zeros((Cp, Cp), jnp.float32).at[:C, :C].set(
        A.astype(jnp.float32)).astype(mxu_dtype)

    try:
        lam_p, Lam_p = _pallas_forward(scal, cj3, gG, mu_p, A_p, TB=TB,
                                       activation=activation,
                                       single_buffer_consts=True)
    except Exception:
        # Fallback for JAX versions without BlockSpec(pipeline_mode=pl.Buffered(1)):
        # default double-buffered constant operands (correct, slightly more VMEM).
        lam_p, Lam_p = _pallas_forward(scal, cj3, gG, mu_p, A_p, TB=TB,
                                       activation=activation,
                                       single_buffer_consts=False)

    return lam_p[:B, 0:1], Lam_p[:B, :C]


def _reference(ci, cj, dts, gt, Gt, mu_all, A, activation="relu"):
    C = A.shape[0]
    ci_oh = jax.nn.one_hot(ci, C, dtype=jnp.float32)                # (B, C)
    cj_oh = jax.nn.one_hot(cj, C, dtype=jnp.float32)                # (B, L, C)
    mu = jnp.sum(ci_oh * mu_all, axis=-1, keepdims=True)            # (B, 1)
    Mu = dts * mu_all                                               # (B, C)
    S_g = jnp.sum(gt[:, :, None] * cj_oh, axis=1)
    S_G = jnp.sum(Gt[:, :, None] * cj_oh, axis=1)
    alpha = jnp.sum((S_g @ A) * ci_oh, axis=-1, keepdims=True)
    Alpha = S_G @ A
    lam, Lam = mu + alpha, Mu + Alpha
    if activation == "relu":
        lam, Lam = jnp.maximum(lam, 0.0), jnp.maximum(Lam, 0.0)
    return lam, Lam


if __name__ == "__main__":
    B, C, L = 8, 16, 8   # batch, num event types, history (memory) length
    key = jax.random.PRNGKey(0)
    k1, k2, k3, k4, k5, k6, k7 = jax.random.split(key, 7)

    # deterministic "parameters"
    mu_all = jax.random.uniform(k1, (1, C), jnp.float32, 0.1, 1.0)   # base intensities
    A = jax.random.uniform(k2, (C, C), jnp.float32, 0.0, 0.5)        # infectivity matrix

    # deterministic sample_dict-style inputs
    ci = jax.random.randint(k3, (B,), 0, C)                          # current event types
    cj = jax.random.randint(k4, (B, L), 0, C)                        # history event types
    dts = jax.random.uniform(k5, (B, 1), jnp.float32, 0.5, 2.0)      # window lengths
    gt = jax.random.uniform(k6, (B, L), jnp.float32, 0.0, 1.0)       # decay values
    Gt = jax.random.uniform(k7, (B, L), jnp.float32, 0.0, 1.0)       # integrated decay

    lam_ref, Lam_ref = _reference(ci, cj, dts, gt, Gt, mu_all, A, activation="relu")

    # f32 MXU-operand path (bit-stable parity with the reference).
    lam, Lam = hawkes_process_intensity(ci, cj, dts, gt, Gt, mu_all, A,
                                        activation="relu")
    jax.block_until_ready((lam, Lam))
    assert lam.shape == (B, 1) and Lam.shape == (B, C)
    assert jnp.allclose(lam, lam_ref, atol=1e-5, rtol=1e-5)
    assert jnp.allclose(Lam, Lam_ref, atol=1e-5, rtol=1e-5)

    # bf16 MXU-operand path (recommended on v6e/v7x): operand rounding only,
    # accumulation stays f32 -> looser tolerance.
    lam_bf, Lam_bf = hawkes_process_intensity(ci, cj, dts, gt, Gt, mu_all, A,
                                              activation="relu",
                                              mxu_dtype=jnp.bfloat16)
    jax.block_until_ready((lam_bf, Lam_bf))
    assert jnp.allclose(lam_bf, lam_ref, atol=5e-2, rtol=5e-2)
    assert jnp.allclose(Lam_bf, Lam_ref, atol=5e-2, rtol=5e-2)

    print("KERNEL_OK")
</pallas_src>

<mosaic_0001>
module attributes {stable_mosaic.version = 11 : i64} {
  func.func @_hawkes_kernel(%arg0: i32, %arg1: i32, %arg2: memref<8x2xf32, #tpu.memory_space<vmem>>, %arg3: memref<1x8x8xi32, #tpu.memory_space<vmem>>, %arg4: memref<2x1x8x8xf32, #tpu.memory_space<vmem>>, %arg5: memref<1x128xf32, #tpu.memory_space<vmem>>, %arg6: memref<128x128xf32, #tpu.memory_space<vmem>>, %arg7: memref<8x128xf32, #tpu.memory_space<vmem>>, %arg8: memref<8x128xf32, #tpu.memory_space<vmem>>, %arg9: memref<16x128xf32, #tpu.memory_space<vmem>>) attributes {dimension_semantics = [#tpu.dimension_semantics<parallel>, #tpu.dimension_semantics<arbitrary>], iteration_bounds = array<i64: 1, 1>, scalar_prefetch = 0 : i64, scratch_operands = 1 : i64, tpu.core_type = #tpu.core_type<tc>, window_params = [{transform_indices = @transform_0, window_bounds = array<i64: 8, 2>}, {transform_indices = @transform_1, window_bounds = array<i64: 1, 8, 8>}, {transform_indices = @transform_2, window_bounds = array<i64: 2, 1, 8, 8>}, {pipeline_mode = #tpu.pipeline_mode<synchronous>, transform_indices = @transform_3, window_bounds = array<i64: 1, 128>}, {pipeline_mode = #tpu.pipeline_mode<synchronous>, transform_indices = @transform_4, window_bounds = array<i64: 128, 128>}, {transform_indices = @transform_5, window_bounds = array<i64: 8, 128>}, {transform_indices = @transform_6, window_bounds = array<i64: 8, 128>}]} {
    %0 = tpu.iota {dimensions = array<i32: 1>} : vector<1x128xi32>
    %c0_i32 = arith.constant 0 : i32
    %1 = arith.cmpi eq, %arg1, %c0_i32 : i32
    %2 = arith.extui %1 : i1 to i32
    %c0_i32_0 = arith.constant 0 : i32
    %3 = arith.cmpi ne, %2, %c0_i32_0 : i32
    scf.if %3 {
      %cst_22 = arith.constant 0.000000e+00 : f32
      %36 = vector.broadcast %cst_22 : f32 to vector<16x128xf32>
      %c0_23 = arith.constant 0 : index
      %c0_24 = arith.constant 0 : index
      %37 = vector.load %arg9[%c0_23, %c0_24] : memref<16x128xf32, #tpu.memory_space<vmem>>, vector<16x128xf32>
      tpu.vector_store %arg9[%c0_23, %c0_24], %36 {strides = array<i32>} : memref<16x128xf32, #tpu.memory_space<vmem>>, vector<16x128xf32>,
    } else {
    }
    %c0 = arith.constant 0 : index
    %c0_1 = arith.constant 0 : index
    %c0_2 = arith.constant 0 : index
    %4 = vector.load %arg3[%c0, %c0_1, %c0_2] : memref<1x8x8xi32, #tpu.memory_space<vmem>>, vector<1x8x8xi32>
    %5 = vector.shape_cast %4 : vector<1x8x8xi32> to vector<8x8xi32>
    %c0_3 = arith.constant 0 : index
    %c0_4 = arith.constant 0 : index
    %c0_5 = arith.constant 0 : index
    %c0_6 = arith.constant 0 : index
    %6 = vector.load %arg4[%c0_3, %c0_4, %c0_5, %c0_6] : memref<2x1x8x8xf32, #tpu.memory_space<vmem>>, vector<1x1x8x8xf32>
    %7 = vector.shape_cast %6 : vector<1x1x8x8xf32> to vector<8x8xf32>
    %c1 = arith.constant 1 : index
    %c0_7 = arith.constant 0 : index
    %c0_8 = arith.constant 0 : index
    %c0_9 = arith.constant 0 : index
    %8 = vector.load %arg4[%c1, %c0_7, %c0_8, %c0_9] : memref<2x1x8x8xf32, #tpu.memory_space<vmem>>, vector<1x1x8x8xf32>
    %9 = vector.shape_cast %8 : vector<1x1x8x8xf32> to vector<8x8xf32>
    %10 = vector.shape_cast %5 : vector<8x8xi32> to vector<8x8x1xi32>
    %11 = vector.shape_cast %0 : vector<1x128xi32> to vector<1x1x128xi32>
    %12 = vector.broadcast %10 : vector<8x8x1xi32> to vector<8x8x128xi32>
    %13 = vector.broadcast %11 : vector<1x1x128xi32> to vector<8x8x128xi32>
    %14 = arith.cmpi eq, %12, %13 : vector<8x8x128xi32>
    %c0_10 = arith.constant 0 : index
    %c0_11 = arith.constant 0 : index
    %15 = vector.load %arg9[%c0_10, %c0_11] : memref<16x128xf32, #tpu.memory_space<vmem>>, vector<8x128xf32>
    %16 = vector.shape_cast %7 : vector<8x8xf32> to vector<8x8x1xf32>
    %cst = arith.constant 0.000000e+00 : f32
    %17 = vector.shape_cast %16 : vector<8x8x1xf32> to vector<8x8x1xf32>
    %18 = vector.broadcast %17 : vector<8x8x1xf32> to vector<8x8x128xf32>
    %19 = vector.broadcast %cst : f32 to vector<8x8x128xf32>
    %20 = arith.select %14, %18, %19 : vector<8x8x128xi1>, vector<8x8x128xf32>
    %cst_12 = arith.constant dense<0.000000e+00> : vector<8x128xf32>
    %21 = vector.multi_reduction <add>, %20, %cst_12 [1] : vector<8x8x128xf32> to vector<8x128xf32>
    %22 = arith.addf %15, %21 : vector<8x128xf32>
    %c0_13 = arith.constant 0 : index
    %c0_14 = arith.constant 0 : index
    %23 = vector.load %arg9[%c0_13, %c0_14] : memref<16x128xf32, #tpu.memory_space<vmem>>, vector<8x128xf32>
    tpu.vector_store %arg9[%c0_13, %c0_14], %22 {strides = array<i32>} : memref<16x128xf32, #tpu.memory_space<vmem>>, vector<8x128xf32>,
    %c8 = arith.constant 8 : index
    %c0_15 = arith.constant 0 : index
    %24 = vector.load %arg9[%c8, %c0_15] : memref<16x128xf32, #tpu.memory_space<vmem>>, vector<8x128xf32>
    %25 = vector.shape_cast %9 : vector<8x8xf32> to vector<8x8x1xf32>
    %cst_16 = arith.constant 0.000000e+00 : f32
    %26 = vector.shape_cast %25 : vector<8x8x1xf32> to vector<8x8x1xf32>
    %27 = vector.broadcast %26 : vector<8x8x1xf32> to vector<8x8x128xf32>
    %28 = vector.broadcast %cst_16 : f32 to vector<8x8x128xf32>
    %29 = arith.select %14, %27, %28 : vector<8x8x128xi1>, vector<8x8x128xf32>
    %cst_17 = arith.constant dense<0.000000e+00> : vector<8x128xf32>
    %30 = vector.multi_reduction <add>, %29, %cst_17 [1] : vector<8x8x128xf32> to vector<8x128xf32>
    %31 = arith.addf %24, %30 : vector<8x128xf32>
    %c8_18 = arith.constant 8 : index
    %c0_19 = arith.constant 0 : index
    %32 = vector.load %arg9[%c8_18, %c0_19] : memref<16x128xf32, #tpu.memory_space<vmem>>, vector<8x128xf32>
    tpu.vector_store %arg9[%c8_18, %c0_19], %31 {strides = array<i32>} : memref<16x128xf32, #tpu.memory_space<vmem>>, vector<8x128xf32>,
    %c0_i32_20 = arith.constant 0 : i32
    %33 = arith.cmpi eq, %arg1, %c0_i32_20 : i32
    %34 = arith.extui %33 : i1 to i32
    %c0_i32_21 = arith.constant 0 : i32
    %35 = arith.cmpi ne, %34, %c0_i32_21 : i32
    scf.if %35 {
      %c0_22 = arith.constant 0 : index
      %c0_23 = arith.constant 0 : index
      %36 = vector.load %arg9[%c0_22, %c0_23] : memref<16x128xf32, #tpu.memory_space<vmem>>, vector<16x128xf32>
      %c0_24 = arith.constant 0 : index
      %c0_25 = arith.constant 0 : index
      %37 = vector.load %arg6[%c0_24, %c0_25] : memref<128x128xf32, #tpu.memory_space<vmem>>, vector<128x128xf32>
      %cst_26 = arith.constant dense<0.000000e+00> : vector<16x128xf32>
      %38 = tpu.matmul %36, %37, %cst_26 {dimension_numbers = #tpu.dot_dimension_numbers<[1], [0], [0], [1], [0, 0, 1, 1], [], []>} : vector<16x128xf32>, vector<128x128xf32>, vector<16x128xf32> -> vector<16x128xf32>
      %c0_27 = arith.constant 0 : index
      %c0_28 = arith.constant 0 : index
      %39 = vector.load %arg2[%c0_27, %c0_28] : memref<8x2xf32, #tpu.memory_space<vmem>>, vector<8x1xf32>
      %40 = arith.fptosi %39 : vector<8x1xf32> to vector<8x1xi32>
      %c0_29 = arith.constant 0 : index
      %c1_30 = arith.constant 1 : index
      %41 = vector.load %arg2[%c0_29, %c1_30] : memref<8x2xf32, #tpu.memory_space<vmem>>, vector<8x1xf32>
      %c0_31 = arith.constant 0 : index
      %c0_32 = arith.constant 0 : index
      %42 = vector.load %arg5[%c0_31, %c0_32] : memref<1x128xf32, #tpu.memory_space<vmem>>, vector<1x128xf32>
      %43 = vector.broadcast %40 : vector<8x1xi32> to vector<8x128xi32>
      %44 = vector.broadcast %0 : vector<1x128xi32> to vector<8x128xi32>
      %45 = arith.cmpi eq, %43, %44 : vector<8x128xi32>
      %cst_33 = arith.constant 0.000000e+00 : f32
      %46 = vector.shape_cast %42 : vector<1x128xf32> to vector<1x128xf32>
      %47 = vector.broadcast %46 : vector<1x128xf32> to vector<8x128xf32>
      %48 = vector.broadcast %cst_33 : f32 to vector<8x128xf32>
      %49 = arith.select %45, %47, %48 : vector<8x128xi1>, vector<8x128xf32>
      %cst_34 = arith.constant dense<0.000000e+00> : vector<8xf32>
      %50 = vector.multi_reduction <add>, %49, %cst_34 [1] : vector<8x128xf32> to vector<8xf32>
      %51 = vector.shape_cast %50 : vector<8xf32> to vector<8x1xf32>
      %52 = vector.extract_strided_slice %38 {offsets = [0, 0], sizes = [8, 128], strides = [1, 1]} : vector<16x128xf32> to vector<8x128xf32>
      %cst_35 = arith.constant 0.000000e+00 : f32
      %53 = vector.broadcast %cst_35 : f32 to vector<8x128xf32>
      %54 = arith.select %45, %52, %53 : vector<8x128xi1>, vector<8x128xf32>
      %cst_36 = arith.constant dense<0.000000e+00> : vector<8xf32>
      %55 = vector.multi_reduction <add>, %54, %cst_36 [1] : vector<8x128xf32> to vector<8xf32>
      %56 = vector.shape_cast %55 : vector<8xf32> to vector<8x1xf32>
      %57 = arith.addf %51, %56 : vector<8x1xf32>
      %58 = vector.broadcast %41 : vector<8x1xf32> to vector<8x128xf32>
      %59 = vector.broadcast %42 : vector<1x128xf32> to vector<8x128xf32>
      %60 = arith.mulf %58, %59 : vector<8x128xf32>
      %61 = vector.extract_strided_slice %38 {offsets = [8, 0], sizes = [8, 128], strides = [1, 1]} : vector<16x128xf32> to vector<8x128xf32>
      %62 = arith.addf %60, %61 : vector<8x128xf32>
      %cst_37 = arith.constant 0.000000e+00 : f32
      %63 = vector.broadcast %cst_37 : f32 to vector<8x1xf32>
      %64 = arith.maximumf %57, %63 : vector<8x1xf32>
      %cst_38 = arith.constant 0.000000e+00 : f32
      %65 = vector.broadcast %cst_38 : f32 to vector<8x128xf32>
      %66 = arith.maximumf %62, %65 : vector<8x128xf32>
      %c0_39 = arith.constant 0 : index
      %c0_40 = arith.constant 0 : index
      %67 = vector.load %arg8[%c0_39, %c0_40] : memref<8x128xf32, #tpu.memory_space<vmem>>, vector<8x128xf32>
      tpu.vector_store %arg8[%c0_39, %c0_40], %66 {strides = array<i32>} : memref<8x128xf32, #tpu.memory_space<vmem>>, vector<8x128xf32>,
      %c0_i32_41 = arith.constant 0 : i32
      %68 = vector.broadcast %c0_i32_41 : i32 to vector<1x128xi32>
      %69 = arith.cmpi eq, %0, %68 : vector<1x128xi32>
      %cst_42 = arith.constant 0.000000e+00 : f32
      %70 = vector.shape_cast %69 : vector<1x128xi1> to vector<1x128xi1>
      %71 = vector.broadcast %70 : vector<1x128xi1> to vector<8x128xi1>
      %72 = vector.shape_cast %64 : vector<8x1xf32> to vector<8x1xf32>
      %73 = vector.broadcast %72 : vector<8x1xf32> to vector<8x128xf32>
      %74 = vector.broadcast %cst_42 : f32 to vector<8x128xf32>
      %75 = arith.select %71, %73, %74 : vector<8x128xi1>, vector<8x128xf32>
      %c0_43 = arith.constant 0 : index
      %c0_44 = arith.constant 0 : index
      %76 = vector.load %arg7[%c0_43, %c0_44] : memref<8x128xf32, #tpu.memory_space<vmem>>, vector<8x128xf32>
      tpu.vector_store %arg7[%c0_43, %c0_44], %75 {strides = array<i32>} : memref<8x128xf32, #tpu.memory_space<vmem>>, vector<8x128xf32>,
    } else {
    }
    return
  }
  func.func @transform_0(%arg0: i32, %arg1: i32) -> (i32, i32) {
    %c0_i32 = arith.constant 0 : i32
    %c0_i32_0 = arith.constant 0 : i32
    return %arg0, %c0_i32 : i32, i32
  }
  func.func @transform_1(%arg0: i32, %arg1: i32) -> (i32, i32, i32) {
    %c0_i32 = arith.constant 0 : i32
    %c0_i32_0 = arith.constant 0 : i32
    return %arg1, %arg0, %c0_i32 : i32, i32, i32
  }
  func.func @transform_2(%arg0: i32, %arg1: i32) -> (i32, i32, i32, i32) {
    %c0_i32 = arith.constant 0 : i32
    %c0_i32_0 = arith.constant 0 : i32
    %c0_i32_1 = arith.constant 0 : i32
    return %c0_i32, %arg1, %arg0, %c0_i32_0 : i32, i32, i32, i32
  }
  func.func @transform_3(%arg0: i32, %arg1: i32) -> (i32, i32) {
    %c0_i32 = arith.constant 0 : i32
    %c0_i32_0 = arith.constant 0 : i32
    %c0_i32_1 = arith.constant 0 : i32
    return %c0_i32, %c0_i32_0 : i32, i32
  }
  func.func @transform_4(%arg0: i32, %arg1: i32) -> (i32, i32) {
    %c0_i32 = arith.constant 0 : i32
    %c0_i32_0 = arith.constant 0 : i32
    %c0_i32_1 = arith.constant 0 : i32
    return %c0_i32, %c0_i32_0 : i32, i32
  }
  func.func @transform_5(%arg0: i32, %arg1: i32) -> (i32, i32) {
    %c0_i32 = arith.constant 0 : i32
    %c0_i32_0 = arith.constant 0 : i32
    return %arg0, %c0_i32 : i32, i32
  }
  func.func @transform_6(%arg0: i32, %arg1: i32) -> (i32, i32) {
    %c0_i32 = arith.constant 0 : i32
    %c0_i32_0 = arith.constant 0 : i32
    return %arg0, %c0_i32 : i32, i32
  }
}

module attributes {stable_mosaic.version = 11 : i64} {
  func.func @_hawkes_kernel(%arg0: i32, %arg1: i32, %arg2: memref<8x2xf32, #tpu.memory_space<vmem>>, %arg3: memref<1x8x8xi32, #tpu.memory_space<vmem>>, %arg4: memref<2x1x8x8xf32, #tpu.memory_space<vmem>>, %arg5: memref<1x128xf32, #tpu.memory_space<vmem>>, %arg6: memref<128x128xf32, #tpu.memory_space<vmem>>, %arg7: memref<8x128xf32, #tpu.memory_space<vmem>>, %arg8: memref<8x128xf32, #tpu.memory_space<vmem>>, %arg9: memref<16x128xf32, #tpu.memory_space<vmem>>) attributes {dimension_semantics = [#tpu.dimension_semantics<parallel>, #tpu.dimension_semantics<arbitrary>], iteration_bounds = array<i64: 1, 1>, scalar_prefetch = 0 : i64, scratch_operands = 1 : i64, tpu.core_type = #tpu.core_type<tc>, window_params = [{transform_indices = @transform_0, window_bounds = array<i64: 8, 2>}, {transform_indices = @transform_1, window_bounds = array<i64: 1, 8, 8>}, {transform_indices = @transform_2, window_bounds = array<i64: 2, 1, 8, 8>}, {pipeline_mode = #tpu.pipeline_mode<synchronous>, transform_indices = @transform_3, window_bounds = array<i64: 1, 128>}, {pipeline_mode = #tpu.pipeline_mode<synchronous>, transform_indices = @transform_4, window_bounds = array<i64: 128, 128>}, {transform_indices = @transform_5, window_bounds = array<i64: 8, 128>}, {transform_indices = @transform_6, window_bounds = array<i64: 8, 128>}]} {
    %0 = tpu.iota {dimensions = array<i32: 1>} : vector<1x128xi32>
    %c0_i32 = arith.constant 0 : i32
    %1 = arith.cmpi eq, %arg1, %c0_i32 : i32
    %2 = arith.extui %1 : i1 to i32
    %c0_i32_0 = arith.constant 0 : i32
    %3 = arith.cmpi ne, %2, %c0_i32_0 : i32
    scf.if %3 {
      %cst_22 = arith.constant 0.000000e+00 : f32
      %36 = vector.broadcast %cst_22 : f32 to vector<16x128xf32>
      %c0_23 = arith.constant 0 : index
      %c0_24 = arith.constant 0 : index
      %37 = vector.load %arg9[%c0_23, %c0_24] : memref<16x128xf32, #tpu.memory_space<vmem>>, vector<16x128xf32>
      tpu.vector_store %arg9[%c0_23, %c0_24], %36 {strides = array<i32>} : memref<16x128xf32, #tpu.memory_space<vmem>>, vector<16x128xf32>,
    } else {
    }
    %c0 = arith.constant 0 : index
    %c0_1 = arith.constant 0 : index
    %c0_2 = arith.constant 0 : index
    %4 = vector.load %arg3[%c0, %c0_1, %c0_2] : memref<1x8x8xi32, #tpu.memory_space<vmem>>, vector<1x8x8xi32>
    %5 = vector.shape_cast %4 : vector<1x8x8xi32> to vector<8x8xi32>
    %c0_3 = arith.constant 0 : index
    %c0_4 = arith.constant 0 : index
    %c0_5 = arith.constant 0 : index
    %c0_6 = arith.constant 0 : index
    %6 = vector.load %arg4[%c0_3, %c0_4, %c0_5, %c0_6] : memref<2x1x8x8xf32, #tpu.memory_space<vmem>>, vector<1x1x8x8xf32>
    %7 = vector.shape_cast %6 : vector<1x1x8x8xf32> to vector<8x8xf32>
    %c1 = arith.constant 1 : index
    %c0_7 = arith.constant 0 : index
    %c0_8 = arith.constant 0 : index
    %c0_9 = arith.constant 0 : index
    %8 = vector.load %arg4[%c1, %c0_7, %c0_8, %c0_9] : memref<2x1x8x8xf32, #tpu.memory_space<vmem>>, vector<1x1x8x8xf32>
    %9 = vector.shape_cast %8 : vector<1x1x8x8xf32> to vector<8x8xf32>
    %10 = vector.shape_cast %5 : vector<8x8xi32> to vector<8x8x1xi32>
    %11 = vector.shape_cast %0 : vector<1x128xi32> to vector<1x1x128xi32>
    %12 = vector.broadcast %10 : vector<8x8x1xi32> to vector<8x8x128xi32>
    %13 = vector.broadcast %11 : vector<1x1x128xi32> to vector<8x8x128xi32>
    %14 = arith.cmpi eq, %12, %13 : vector<8x8x128xi32>
    %c0_10 = arith.constant 0 : index
    %c0_11 = arith.constant 0 : index
    %15 = vector.load %arg9[%c0_10, %c0_11] : memref<16x128xf32, #tpu.memory_space<vmem>>, vector<8x128xf32>
    %16 = vector.shape_cast %7 : vector<8x8xf32> to vector<8x8x1xf32>
    %cst = arith.constant 0.000000e+00 : f32
    %17 = vector.shape_cast %16 : vector<8x8x1xf32> to vector<8x8x1xf32>
    %18 = vector.broadcast %17 : vector<8x8x1xf32> to vector<8x8x128xf32>
    %19 = vector.broadcast %cst : f32 to vector<8x8x128xf32>
    %20 = arith.select %14, %18, %19 : vector<8x8x128xi1>, vector<8x8x128xf32>
    %cst_12 = arith.constant dense<0.000000e+00> : vector<8x128xf32>
    %21 = vector.multi_reduction <add>, %20, %cst_12 [1] : vector<8x8x128xf32> to vector<8x128xf32>
    %22 = arith.addf %15, %21 : vector<8x128xf32>
    %c0_13 = arith.constant 0 : index
    %c0_14 = arith.constant 0 : index
    %23 = vector.load %arg9[%c0_13, %c0_14] : memref<16x128xf32, #tpu.memory_space<vmem>>, vector<8x128xf32>
    tpu.vector_store %arg9[%c0_13, %c0_14], %22 {strides = array<i32>} : memref<16x128xf32, #tpu.memory_space<vmem>>, vector<8x128xf32>,
    %c8 = arith.constant 8 : index
    %c0_15 = arith.constant 0 : index
    %24 = vector.load %arg9[%c8, %c0_15] : memref<16x128xf32, #tpu.memory_space<vmem>>, vector<8x128xf32>
    %25 = vector.shape_cast %9 : vector<8x8xf32> to vector<8x8x1xf32>
    %cst_16 = arith.constant 0.000000e+00 : f32
    %26 = vector.shape_cast %25 : vector<8x8x1xf32> to vector<8x8x1xf32>
    %27 = vector.broadcast %26 : vector<8x8x1xf32> to vector<8x8x128xf32>
    %28 = vector.broadcast %cst_16 : f32 to vector<8x8x128xf32>
    %29 = arith.select %14, %27, %28 : vector<8x8x128xi1>, vector<8x8x128xf32>
    %cst_17 = arith.constant dense<0.000000e+00> : vector<8x128xf32>
    %30 = vector.multi_reduction <add>, %29, %cst_17 [1] : vector<8x8x128xf32> to vector<8x128xf32>
    %31 = arith.addf %24, %30 : vector<8x128xf32>
    %c8_18 = arith.constant 8 : index
    %c0_19 = arith.constant 0 : index
    %32 = vector.load %arg9[%c8_18, %c0_19] : memref<16x128xf32, #tpu.memory_space<vmem>>, vector<8x128xf32>
    tpu.vector_store %arg9[%c8_18, %c0_19], %31 {strides = array<i32>} : memref<16x128xf32, #tpu.memory_space<vmem>>, vector<8x128xf32>,
    %c0_i32_20 = arith.constant 0 : i32
    %33 = arith.cmpi eq, %arg1, %c0_i32_20 : i32
    %34 = arith.extui %33 : i1 to i32
    %c0_i32_21 = arith.constant 0 : i32
    %35 = arith.cmpi ne, %34, %c0_i32_21 : i32
    scf.if %35 {
      %c0_22 = arith.constant 0 : index
      %c0_23 = arith.constant 0 : index
      %36 = vector.load %arg9[%c0_22, %c0_23] : memref<16x128xf32, #tpu.memory_space<vmem>>, vector<16x128xf32>
      %c0_24 = arith.constant 0 : index
      %c0_25 = arith.constant 0 : index
      %37 = vector.load %arg6[%c0_24, %c0_25] : memref<128x128xf32, #tpu.memory_space<vmem>>, vector<128x128xf32>
      %cst_26 = arith.constant dense<0.000000e+00> : vector<16x128xf32>
      %38 = tpu.matmul %36, %37, %cst_26 {dimension_numbers = #tpu.dot_dimension_numbers<[1], [0], [0], [1], [0, 0, 1, 1], [], []>} : vector<16x128xf32>, vector<128x128xf32>, vector<16x128xf32> -> vector<16x128xf32>
      %c0_27 = arith.constant 0 : index
      %c0_28 = arith.constant 0 : index
      %39 = vector.load %arg2[%c0_27, %c0_28] : memref<8x2xf32, #tpu.memory_space<vmem>>, vector<8x1xf32>
      %40 = arith.fptosi %39 : vector<8x1xf32> to vector<8x1xi32>
      %c0_29 = arith.constant 0 : index
      %c1_30 = arith.constant 1 : index
      %41 = vector.load %arg2[%c0_29, %c1_30] : memref<8x2xf32, #tpu.memory_space<vmem>>, vector<8x1xf32>
      %c0_31 = arith.constant 0 : index
      %c0_32 = arith.constant 0 : index
      %42 = vector.load %arg5[%c0_31, %c0_32] : memref<1x128xf32, #tpu.memory_space<vmem>>, vector<1x128xf32>
      %43 = vector.broadcast %40 : vector<8x1xi32> to vector<8x128xi32>
      %44 = vector.broadcast %0 : vector<1x128xi32> to vector<8x128xi32>
      %45 = arith.cmpi eq, %43, %44 : vector<8x128xi32>
      %cst_33 = arith.constant 0.000000e+00 : f32
      %46 = vector.shape_cast %42 : vector<1x128xf32> to vector<1x128xf32>
      %47 = vector.broadcast %46 : vector<1x128xf32> to vector<8x128xf32>
      %48 = vector.broadcast %cst_33 : f32 to vector<8x128xf32>
      %49 = arith.select %45, %47, %48 : vector<8x128xi1>, vector<8x128xf32>
      %cst_34 = arith.constant dense<0.000000e+00> : vector<8xf32>
      %50 = vector.multi_reduction <add>, %49, %cst_34 [1] : vector<8x128xf32> to vector<8xf32>
      %51 = vector.shape_cast %50 : vector<8xf32> to vector<8x1xf32>
      %52 = vector.extract_strided_slice %38 {offsets = [0, 0], sizes = [8, 128], strides = [1, 1]} : vector<16x128xf32> to vector<8x128xf32>
      %cst_35 = arith.constant 0.000000e+00 : f32
      %53 = vector.broadcast %cst_35 : f32 to vector<8x128xf32>
      %54 = arith.select %45, %52, %53 : vector<8x128xi1>, vector<8x128xf32>
      %cst_36 = arith.constant dense<0.000000e+00> : vector<8xf32>
      %55 = vector.multi_reduction <add>, %54, %cst_36 [1] : vector<8x128xf32> to vector<8xf32>
      %56 = vector.shape_cast %55 : vector<8xf32> to vector<8x1xf32>
      %57 = arith.addf %51, %56 : vector<8x1xf32>
      %58 = vector.broadcast %41 : vector<8x1xf32> to vector<8x128xf32>
      %59 = vector.broadcast %42 : vector<1x128xf32> to vector<8x128xf32>
      %60 = arith.mulf %58, %59 : vector<8x128xf32>
      %61 = vector.extract_strided_slice %38 {offsets = [8, 0], sizes = [8, 128], strides = [1, 1]} : vector<16x128xf32> to vector<8x128xf32>
      %62 = arith.addf %60, %61 : vector<8x128xf32>
      %cst_37 = arith.constant 0.000000e+00 : f32
      %63 = vector.broadcast %cst_37 : f32 to vector<8x1xf32>
      %64 = arith.maximumf %57, %63 : vector<8x1xf32>
      %cst_38 = arith.constant 0.000000e+00 : f32
      %65 = vector.broadcast %cst_38 : f32 to vector<8x128xf32>
      %66 = arith.maximumf %62, %65 : vector<8x128xf32>
      %c0_39 = arith.constant 0 : index
      %c0_40 = arith.constant 0 : index
      %67 = vector.load %arg8[%c0_39, %c0_40] : memref<8x128xf32, #tpu.memory_space<vmem>>, vector<8x128xf32>
      tpu.vector_store %arg8[%c0_39, %c0_40], %66 {strides = array<i32>} : memref<8x128xf32, #tpu.memory_space<vmem>>, vector<8x128xf32>,
      %c0_i32_41 = arith.constant 0 : i32
      %68 = vector.broadcast %c0_i32_41 : i32 to vector<1x128xi32>
      %69 = arith.cmpi eq, %0, %68 : vector<1x128xi32>
      %cst_42 = arith.constant 0.000000e+00 : f32
      %70 = vector.shape_cast %69 : vector<1x128xi1> to vector<1x128xi1>
      %71 = vector.broadcast %70 : vector<1x128xi1> to vector<8x128xi1>
      %72 = vector.shape_cast %64 : vector<8x1xf32> to vector<8x1xf32>
      %73 = vector.broadcast %72 : vector<8x1xf32> to vector<8x128xf32>
      %74 = vector.broadcast %cst_42 : f32 to vector<8x128xf32>
      %75 = arith.select %71, %73, %74 : vector<8x128xi1>, vector<8x128xf32>
      %c0_43 = arith.constant 0 : index
      %c0_44 = arith.constant 0 : index
      %76 = vector.load %arg7[%c0_43, %c0_44] : memref<8x128xf32, #tpu.memory_space<vmem>>, vector<8x128xf32>
      tpu.vector_store %arg7[%c0_43, %c0_44], %75 {strides = array<i32>} : memref<8x128xf32, #tpu.memory_space<vmem>>, vector<8x128xf32>,
    } else {
    }
    return
  }
  func.func @transform_0(%arg0: i32, %arg1: i32) -> (i32, i32) {
    %c0_i32 = arith.constant 0 : i32
    %c0_i32_0 = arith.constant 0 : i32
    return %arg0, %c0_i32 : i32, i32
  }
  func.func @transform_1(%arg0: i32, %arg1: i32) -> (i32, i32, i32) {
    %c0_i32 = arith.constant 0 : i32
    %c0_i32_0 = arith.constant 0 : i32
    return %arg1, %arg0, %c0_i32 : i32, i32, i32
  }
  func.func @transform_2(%arg0: i32, %arg1: i32) -> (i32, i32, i32, i32) {
    %c0_i32 = arith.constant 0 : i32
    %c0_i32_0 = arith.constant 0 : i32
    %c0_i32_1 = arith.constant 0 : i32
    return %c0_i32, %arg1, %arg0, %c0_i32_0 : i32, i32, i32, i32
  }
  func.func @transform_3(%arg0: i32, %arg1: i32) -> (i32, i32) {
    %c0_i32 = arith.constant 0 : i32
    %c0_i32_0 = arith.constant 0 : i32
    %c0_i32_1 = arith.constant 0 : i32
    return %c0_i32, %c0_i32_0 : i32, i32
  }
  func.func @transform_4(%arg0: i32, %arg1: i32) -> (i32, i32) {
    %c0_i32 = arith.constant 0 : i32
    %c0_i32_0 = arith.constant 0 : i32
    %c0_i32_1 = arith.constant 0 : i32
    return %c0_i32, %c0_i32_0 : i32, i32
  }
  func.func @transform_5(%arg0: i32, %arg1: i32) -> (i32, i32) {
    %c0_i32 = arith.constant 0 : i32
    %c0_i32_0 = arith.constant 0 : i32
    return %arg0, %c0_i32 : i32, i32
  }
  func.func @transform_6(%arg0: i32, %arg1: i32) -> (i32, i32) {
    %c0_i32 = arith.constant 0 : i32
    %c0_i32_0 = arith.constant 0 : i32
    return %arg0, %c0_i32 : i32, i32
  }
}

</mosaic_0001>

<bundles_post_ra>
// kernel: tpu_custom_call.1
= control target key start
LH: loop header
LB: loop body
LE: loop exit
PB: predicated region body
PF: predicated region fallthrough
CT: control target
= control target key end

     0   :  { %12 = vsyncpa [#allocation4], 0  ;;  %s877_s0 = inlined_call_operand.vmem [shape: f32[8,2], index: 0, kind: input, shape index: {}]   ;;  %s878_s1 = inlined_call_operand.vmem [shape: s32[1,8,8], index: 1, kind: input, shape index: {}]   ;;  %s879_s2 = inlined_call_operand.hbm [shape: f32[2,1,8,8], index: 2, kind: input, shape index: {}]   ;;  %s880_s3 = inlined_call_operand.vmem [shape: f32[1,128], index: 3, kind: input, shape index: {}]   ;;  %s881_s4 = inlined_call_operand.hbm [shape: f32[128,128], index: 4, kind: input, shape index: {}]   ;;  %s882_s5 = inlined_call_operand.hbm [shape: f32[8,128], index: 5, kind: output, shape index: {0}]   ;;  %s883_s6 = inlined_call_operand.hbm [shape: f32[8,128], index: 6, kind: output, shape index: {1}]  }
   0x1   :  { %13 = vsyncpa [#allocation7], 0 }
   0x2   :  { %14 = vsyncpa [#allocation5], 0 }
   0x3   :  { %15 = vsyncpa [#allocation10], 0  ;;  %s713_s21 = smov [#allocation3]  }
   0x4   :  { %s25_s22 = sshll.u32 %s713_s21, 4  ;;  %s26_s22 = int_to_ptr.vmem [resolvable:$true] %s25_s22 }
   0x5   :  { %s633_s23 = scalar_lea.vmem %s26_s22, 256  ;;  %p638_p1 = scmp.lt.s32.totalorder %s26_s22, %s26_s22 }
   0x6   :  { %p634_p0 = scmp.ne.s32.totalorder %s26_s22, %s633_s23  ;;  %p639_p2 = scmp.lt.s32.totalorder %s633_s23, %s633_s23 }
   0x8   :  { %p640_p3 = por %p639_p2, %p638_p1 }
   0xa   :  { %p641_p4 = pnand %p640_p3, %p634_p0 }
   0xc   :  { %644 = shalt.err (!%p641_p4)
}
   0xd   :  { %s714_s24 = smov 128   ;;  %s715_s25 = smov 8  }
   0xe   :  { %31 = dma.hbm_to_vmem [thread:$0]  %s879_s2, 256, %s26_s22, [#allocation4], %s714_s24, %s714_s24, %s715_s25  }
   0xf   :  { %s716_s28 = smov [#allocation6]  }
  0x10   :  { %s39_s29 = sshll.u32 %s716_s28, 4  ;;  %s40_s29 = int_to_ptr.vmem [resolvable:$true] %s39_s29 }
  0x11   :  { %s653_s30 = scalar_lea.vmem %s40_s29, 2048  ;;  %p658_p6 = scmp.lt.s32.totalorder %s40_s29, %s40_s29 }
  0x12   :  { %p654_p5 = scmp.ne.s32.totalorder %s40_s29, %s653_s30  ;;  %p659_p7 = scmp.lt.s32.totalorder %s653_s30, %s653_s30 }
  0x14   :  { %p660_p8 = por %p659_p7, %p658_p6 }
  0x16   :  { %p661_p9 = pnand %p660_p8, %p654_p5 }
  0x18   :  { %664 = shalt.err (!%p661_p9)
}
  0x19   :  { %45 = dma.hbm_to_vmem [thread:$0]  %s881_s4, 2048, %s40_s29, [#allocation7], %s714_s24, %s714_s24, %s715_s25  }
  0x1a   :  { %705 = dma.done.wait [#allocation4], 256  }
  0x1b   :  { %706 = vsyncadd [#allocation4], 4294967040 }
  0x1c   :  { %707 = dma.done.wait [#allocation7], 2048  }
  0x1d   :  { %708 = vsyncadd [#allocation7], 4294965248  ;;  %v52_v0 = vlaneseq  ;;  %v717_v1 = vmov 0   ;;  %v766_v6 = vld [vmem:[%s878_s1] sm:$0xff]  ;;  %v776_v15 = vld [vmem:[#allocation3 + $0x8] sm:$0xff]  ;;  %v718_v55 = vmov 1  }
  0x1e   :  { %622 = vset.pattern.permute.xlu0 %v717_v1  ;;  %v768_v7 = vld [vmem:[#allocation3] sm:$0xff]  ;;  %v417_v21 = vld [vmem:[#allocation6 + $0x78] sm:$0xff]  ;;  %v415_v26 = vld [vmem:[#allocation6 + $0x68] sm:$0xff]  ;;  %623 = vset.pattern.permute.xlu1 %v718_v55  ;;  %vm249_vm5 = vcmask 1041409   ;;  %vm251_vm7 = vcmask 1042434   ;;  %vm253_vm9 = vcmask 1043459  }
  0x1f   :  { %v65_v2 = vshrl.u32 %v52_v0, 7  ;;  %577 = vmatprep.subr.mxu0 %v417_v21  ;;  %v416_v25 = vld [vmem:[#allocation6 + $0x70] sm:$0xff]  ;;  %v414_v30 = vld [vmem:[#allocation6 + $0x60] sm:$0xff]  ;;  %v413_v31 = vld [vmem:[#allocation6 + $0x58] sm:$0xff]  ;;  %v803_v1 = vand.u32 127, %v52_v0  ;;  %vm255_vm11 = vcmask 1044484  }
  0x20   :  { %578 = vmatpush3.msra.mxu0 %v417_v21  ;;  %v412_v34 = vld [vmem:[#allocation6 + $0x50] sm:$0xff]  ;;  %v411_v38 = vld [vmem:[#allocation6 + $0x48] sm:$0xff]  ;;  %v410_v39 = vld [vmem:[#allocation6 + $0x40] sm:$0xff]  ;;  %vm257_vm12 = vcmask 1045509   ;;  %vm259_vm13 = vcmask 1046534   ;;  %vm261_vm14 = vcmask 1047559  }
  0x21   :  { %v80_v3 = vsub.s32 2, %v65_v2  ;;  %v66_v4 = vsub.s32 0, %v65_v2  ;;  %v73_v5 = vsub.s32 1, %v65_v2  ;;  %v87_v12 = vsub.s32 3, %v65_v2  ;;  %579 = vmatprep.subr.mxu0 %v416_v25  ;;  %v409_v42 = vld [vmem:[#allocation6 + $0x38] sm:$0xff]  ;;  %v408_v45 = vld [vmem:[#allocation6 + $0x30] sm:$0xff] }
  0x22   :  { %v94_v18 = vsub.s32 4, %v65_v2  ;;  %v101_v24 = vsub.s32 5, %v65_v2  ;;  %580 = vmatpush3.msra.mxu0 %v416_v25  ;;  %v108_v29 = vsub.s32 6, %v65_v2  ;;  %v115_v37 = vsub.s32 7, %v65_v2  ;;  %v797_v46 = vld [vmem:[%s877_s0] sm:$0xff]  ;;  %v407_v47 = vld [vmem:[#allocation6 + $0x28] sm:$0xff] }
  0x23   :  { %v81_v8 = vrot.slane %v766_v6, %v80_v3  ;;  %v67_v9 = vrot.slane %v766_v6, %v66_v4  ;;  %v132_v10 = vrot.slane %v768_v7, %v66_v4  ;;  %v74_v11 = vrot.slane %v766_v6, %v73_v5  ;;  %581 = vmatprep.subr.mxu0 %v415_v26  ;;  %v406_v51 = vld [vmem:[#allocation6 + $0x20] sm:$0xff]  ;;  %v405_v53 = vld [vmem:[#allocation6 + $0x18] sm:$0xff]  ;;  %v404_v54 = vld [vmem:[#allocation6 + $0x10] sm:$0xff] }
  0x24   :  { %v88_v13 = vrot.slane %v766_v6, %v87_v12  ;;  %v139_v14 = vrot.slane %v768_v7, %v73_v5  ;;  %v270_v16 = vrot.slane %v776_v15, %v66_v4  ;;  %v146_v17 = vrot.slane %v768_v7, %v80_v3  ;;  %582 = vmatpush3.msra.mxu0 %v415_v26  ;;  %v403_v56 = vld [vmem:[#allocation6 + $0x8] sm:$0xff]  ;;  %v402_v57 = vld [vmem:[#allocation6] sm:$0xff] }
  0x25   :  { %83 = vbcast.lane.b32.xlu1 %v81_v8, 256  ;;  %69 = vbcast.lane.b32.xlu0 %v67_v9, 256  ;;  %v95_v19 = vrot.slane %v766_v6, %v94_v18  ;;  %v277_v20 = vrot.slane %v776_v15, %v73_v5  ;;  %v284_v22 = vrot.slane %v776_v15, %v80_v3  ;;  %v612_v50 = vtrunc.f32 %v797_v46 }
  0x26   :  { %v153_v23 = vrot.slane %v768_v7, %v87_v12  ;;  %v160_v27 = vrot.slane %v768_v7, %v94_v18  ;;  %v102_v28 = vrot.slane %v766_v6, %v101_v24  ;;  %583 = vmatprep.subr.mxu0 %v414_v30  ;;  %v109_v32 = vrot.slane %v766_v6, %v108_v29 }
  0x27   :  { %v291_v33 = vrot.slane %v776_v15, %v87_v12  ;;  %584 = vmatpush3.msra.mxu0 %v414_v30  ;;  %v298_v35 = vrot.slane %v776_v15, %v94_v18  ;;  %v167_v36 = vrot.slane %v768_v7, %v101_v24  ;;  %v174_v40 = vrot.slane %v768_v7, %v108_v29 }
  0x28   :  { %585 = vmatprep.subr.mxu0 %v413_v31  ;;  %v116_v41 = vrot.slane %v766_v6, %v115_v37  ;;  %v181_v43 = vrot.slane %v768_v7, %v115_v37  ;;  %v305_v44 = vrot.slane %v776_v15, %v101_v24  ;;  %v319_v48 = vrot.slane %v776_v15, %v115_v37 }
  0x29   :  { %134 = vbcast.lane.b32.xlu1 %v132_v10, 256  ;;  %76 = vbcast.lane.b32.xlu0 %v74_v11, 256  ;;  %v312_v49 = vrot.slane %v776_v15, %v108_v29  ;;  %v613_v52 = vcvt.f32.s32 %v612_v50 }
  0x2a   :  { %586 = vmatpush3.msra.mxu0 %v413_v31 }
  0x2b   :  { %587 = vmatprep.subr.mxu0 %v412_v34 }
  0x2c   :  { %588 = vmatpush3.msra.mxu0 %v412_v34 }
  0x2d   :  { %90 = vbcast.lane.b32.xlu1 %v88_v13, 256  ;;  %141 = vbcast.lane.b32.xlu0 %v139_v14, 256 }
  0x2e   :  { %589 = vmatprep.subr.mxu0 %v411_v38 }
  0x2f   :  { %590 = vmatpush3.msra.mxu0 %v411_v38 }
  0x30   :  { %591 = vmatprep.subr.mxu0 %v410_v39 }
  0x31   :  { %272 = vbcast.lane.b32.xlu1 %v270_v16, 256  ;;  %148 = vbcast.lane.b32.xlu0 %v146_v17, 256 }
  0x32   :  { %592 = vmatpush3.msra.mxu0 %v410_v39 }
  0x33   :  { %593 = vmatprep.subr.mxu0 %v409_v42 }
  0x34   :  { %594 = vmatpush3.msra.mxu0 %v409_v42 }
  0x35   :  { %97 = vbcast.lane.b32.xlu1 %v95_v19, 256  ;;  %279 = vbcast.lane.b32.xlu0 %v277_v20, 256 }
  0x36   :  { %595 = vmatprep.subr.mxu0 %v408_v45 }
  0x37   :  { %596 = vmatpush3.msra.mxu0 %v408_v45 }
  0x38   :  { %597 = vmatprep.subr.mxu0 %v407_v47 }
  0x39   :  { %286 = vbcast.lane.b32.xlu1 %v284_v22, 256  ;;  %155 = vbcast.lane.b32.xlu0 %v153_v23, 256 }
  0x3a   :  { %598 = vmatpush3.msra.mxu0 %v407_v47 }
  0x3b   :  { %599 = vmatprep.subr.mxu0 %v406_v51 }
  0x3c   :  { %600 = vmatpush3.msra.mxu0 %v406_v51 }
  0x3d   :  { %162 = vbcast.lane.b32.xlu1 %v160_v27, 256  ;;  %104 = vbcast.lane.b32.xlu0 %v102_v28, 256 }
  0x3e   :  { %601 = vmatprep.subr.mxu0 %v405_v53 }
  0x3f   :  { %602 = vmatpush3.msra.mxu0 %v405_v53 }
  0x40   :  { %603 = vmatprep.subr.mxu0 %v404_v54 }
  0x41   :  { %111 = vbcast.lane.b32.xlu1 %v109_v32, 256  ;;  %293 = vbcast.lane.b32.xlu0 %v291_v33, 256 }
  0x42   :  { %604 = vmatpush3.msra.mxu0 %v404_v54 }
  0x43   :  { %605 = vmatprep.subr.mxu0 %v403_v56 }
  0x44   :  { %606 = vmatpush3.msra.mxu0 %v403_v56 }
  0x45   :  { %300 = vbcast.lane.b32.xlu1 %v298_v35, 256  ;;  %169 = vbcast.lane.b32.xlu0 %v167_v36, 256 }
  0x46   :  { %607 = vmatprep.subr.mxu0 %v402_v57 }
  0x47   :  { %608 = vmatpush3.msra.mxu0 %v402_v57 }
  0x49   :  { %176 = vbcast.lane.b32.xlu1 %v174_v40, 256  ;;  %118 = vbcast.lane.b32.xlu0 %v116_v41, 256 }
  0x4d   :  { %183 = vbcast.lane.b32.xlu1 %v181_v43, 256  ;;  %307 = vbcast.lane.b32.xlu0 %v305_v44, 256 }
  0x51   :  { %321 = vbcast.lane.b32.xlu1 %v319_v48, 256  ;;  %314 = vbcast.lane.b32.xlu0 %v312_v49, 256 }
  0x55   :  { %497 = vperm.xlu0 %622, %v613_v52  }
  0x59   :  { %624 = vset.pattern.permute.xlu0 %v718_v55 }
  0x97   :  { %v84_v58 = vpop.permute.xlu1 %83  ;;  %v70_v59 = vpop.permute.xlu0 %69 }
  0x98   :  { %vm122_vm1 = vcmp.eq.s32.totalorder %v84_v58, %v803_v1  ;;  %vm120_vm2 = vcmp.eq.s32.totalorder %v70_v59, %v803_v1 }
  0x9b   :  { %v135_v60 = vpop.permute.xlu1 %134  ;;  %v77_v61 = vpop.permute.xlu0 %76 }
  0x9c   :  { %vm121_vm0 = vcmp.eq.s32.totalorder %v77_v61, %v803_v1  ;;  %v185_v6 = vsel %vm120_vm2, %v135_v60, 0.0 }
  0x9d   :  { %v193_v11 = vrot.slane %v185_v6, 4 }
  0x9f   :  { %v91_v62 = vpop.permute.xlu1 %90  ;;  %v142_v63 = vpop.permute.xlu0 %141  ;;  %v194_v17 = vadd.f32 %v193_v11, %v185_v6 }
  0xa0   :  { %v186_v4 = vsel %vm121_vm0, %v142_v63, 0.0  ;;  %vm123_vm3 = vcmp.eq.s32.totalorder %v91_v62, %v803_v1 }
  0xa1   :  { %v199_v7 = vrot.slane %v186_v4, 4  ;;  %v195_v27 = vrot.slane %v194_v17, 2 }
  0xa3   :  { %v273_v2 = vpop.permute.xlu1 %272  ;;  %v149_v3 = vpop.permute.xlu0 %148  ;;  %v200_v12 = vadd.f32 %v199_v7, %v186_v4  ;;  %v196_v39 = vadd.f32 %v195_v27, %v194_v17 }
  0xa4   :  { %v187_v5 = vsel %vm122_vm1, %v149_v3, 0.0  ;;  %v323_v10 = vsel %vm120_vm2, %v273_v2, 0.0 }
  0xa5   :  { %v205_v0 = vrot.slane %v187_v5, 4  ;;  %v331_v15 = vrot.slane %v323_v10, 4  ;;  %v201_v19 = vrot.slane %v200_v12, 2  ;;  %v197_v55 = vrot.slane %v196_v39, 1 }
  0xa7   :  { %v98_v8 = vpop.permute.xlu1 %97  ;;  %v280_v9 = vpop.permute.xlu0 %279  ;;  %v206_v16 = vadd.f32 %v205_v0, %v187_v5  ;;  %v332_v23 = vadd.f32 %v331_v15, %v323_v10  ;;  %v202_v31 = vadd.f32 %v201_v19, %v200_v12 }
  0xa8   :  { %v324_v18 = vsel %vm121_vm0, %v280_v9, 0.0  ;;  %vm124_vm4 = vcmp.eq.s32.totalorder %v98_v8, %v803_v1  ;;  %v198_v9 = vadd.f32 %v197_v55, %v196_v39 }
  0xa9   :  { %v207_v24 = vrot.slane %v206_v16, 2  ;;  %v337_v26 = vrot.slane %v324_v18, 4  ;;  %v333_v34 = vrot.slane %v332_v23, 2  ;;  %v203_v43 = vrot.slane %v202_v31, 1 }
  0xab   :  { %v287_v13 = vpop.permute.xlu1 %286  ;;  %v156_v14 = vpop.permute.xlu0 %155  ;;  %v208_v35 = vadd.f32 %v207_v24, %v206_v16  ;;  %v338_v37 = vadd.f32 %v337_v26, %v324_v18  ;;  %v334_v47 = vadd.f32 %v333_v34, %v332_v23  ;;  %v204_v63 = vadd.f32 %v203_v43, %v202_v31 }
  0xac   :  { %v188_v20 = vsel %vm123_vm3, %v156_v14, 0.0  ;;  %v325_v28 = vsel %vm122_vm1, %v287_v13, 0.0 }
  0xad   :  { %v211_v29 = vrot.slane %v188_v20, 4  ;;  %v343_v38 = vrot.slane %v325_v28, 4  ;;  %v209_v48 = vrot.slane %v208_v35, 1  ;;  %v339_v51 = vrot.slane %v338_v37, 2 }
  0xae   :  { %v335_v2 = vrot.slane %v334_v47, 1  ;;  %v250_v17 = vsel %vm249_vm5, %v204_v63, %v198_v9 }
  0xaf   :  { %v163_v21 = vpop.permute.xlu1 %162  ;;  %v818_v22 = vpop.permute.xlu0 %104  ;;  %v212_v40 = vadd.f32 %v211_v29, %v188_v20  ;;  %v344_v52 = vadd.f32 %v343_v38, %v325_v28  ;;  %v210_v3 = vadd.f32 %v209_v48, %v208_v35  ;;  %v340_v5 = vadd.f32 %v339_v51, %v338_v37 }
  0xb0   :  { %v189_v25 = vsel %vm124_vm4, %v163_v21, 0.0  ;;  %vm125_vm6 = vcmp.eq.s32.totalorder %v818_v22, %v803_v1  ;;  %v336_v18 = vadd.f32 %v335_v2, %v334_v47 }
  0xb1   :  { %v217_v30 = vrot.slane %v189_v25, 4  ;;  %v213_v56 = vrot.slane %v212_v40, 2  ;;  %v345_v6 = vrot.slane %v344_v52, 2  ;;  %v252_v21 = vsel %vm251_vm7, %v210_v3, %v250_v17 }
  0xb2   :  { %v341_v23 = vrot.slane %v340_v5, 1 }
  0xb3   :  { %v824_v32 = vpop.permute.xlu1 %111  ;;  %v294_v33 = vpop.permute.xlu0 %293  ;;  %v218_v41 = vadd.f32 %v217_v30, %v189_v25  ;;  %v214_v0 = vadd.f32 %v213_v56, %v212_v40  ;;  %v346_v24 = vadd.f32 %v345_v6, %v344_v52 }
  0xb4   :  { %v326_v36 = vsel %vm123_vm3, %v294_v33, 0.0  ;;  %vm126_vm8 = vcmp.eq.s32.totalorder %v824_v32, %v803_v1 }
  0xb5   :  { %v349_v42 = vrot.slane %v326_v36, 4  ;;  %v219_v57 = vrot.slane %v218_v41, 2  ;;  %v215_v26 = vrot.slane %v214_v0, 1  ;;  %v347_v40 = vrot.slane %v346_v24, 1 }
  0xb7   :  { %v301_v44 = vpop.permute.xlu1 %300  ;;  %v170_v45 = vpop.permute.xlu0 %169  ;;  %v350_v58 = vadd.f32 %v349_v42, %v326_v36  ;;  %v220_v10 = vadd.f32 %v219_v57, %v218_v41  ;;  %v348_v57 = vadd.f32 %v347_v40, %v346_v24 }
  0xb8   :  { %v327_v49 = vsel %vm124_vm4, %v301_v44, 0.0  ;;  %v190_v50 = vsel %vm125_vm6, %v170_v45, 0.0  ;;  %v216_v44 = vadd.f32 %v215_v26, %v214_v0 }
  0xb9   :  { %v355_v53 = vrot.slane %v327_v49, 4  ;;  %v223_v54 = vrot.slane %v190_v50, 4  ;;  %v351_v11 = vrot.slane %v350_v58, 2  ;;  %v221_v30 = vrot.slane %v220_v10, 1 }
  0xba   :  { %v254_v63 = vsel %vm253_vm9, %v216_v44, %v252_v21 }
  0xbb   :  { %v356_v59 = vadd.f32 %v355_v53, %v327_v49  ;;  %v224_v60 = vadd.f32 %v223_v54, %v190_v50  ;;  %v177_v61 = vpop.permute.xlu1 %176  ;;  %v119_v62 = vpop.permute.xlu0 %118  ;;  %v352_v27 = vadd.f32 %v351_v11, %v350_v58  ;;  %v222_v49 = vadd.f32 %v221_v30, %v220_v10 }
  0xbc   :  { %v191_v4 = vsel %vm126_vm8, %v177_v61, 0.0  ;;  %vm127_vm10 = vcmp.eq.s32.totalorder %v119_v62, %v803_v1  ;;  %v342_v53 = vadd.f32 %v341_v23, %v340_v5 }
  0xbd   :  { %v225_v7 = vrot.slane %v224_v60, 2  ;;  %v229_v8 = vrot.slane %v191_v4, 4  ;;  %v357_v12 = vrot.slane %v356_v59, 2  ;;  %v353_v45 = vrot.slane %v352_v27, 1 }
  0xbe   :  { %v256_v6 = vsel %vm255_vm11, %v222_v49, %v254_v63 }
  0xbf   :  { %v226_v13 = vadd.f32 %v225_v7, %v224_v60  ;;  %v230_v14 = vadd.f32 %v229_v8, %v191_v4  ;;  %v184_v15 = vpop.permute.xlu1 %183  ;;  %v308_v16 = vpop.permute.xlu0 %307  ;;  %v358_v31 = vadd.f32 %v357_v12, %v356_v59  ;;  %v354_v60 = vadd.f32 %v353_v45, %v352_v27 }
  0xc0   :  { %v192_v19 = vsel %vm127_vm10, %v184_v15, 0.0  ;;  %v328_v20 = vsel %vm125_vm6, %v308_v16, 0.0  ;;  %v387_v7 = vsel %vm249_vm5, %v342_v53, %v336_v18  ;;  %v558_v18 = vld [vmem:[%s880_s3] ss:$0 sm:$0xff]  ;;  %s719_s3 = smov [#allocation9]  }
  0xc1   :  { %v231_v25 = vrot.slane %v230_v14, 2  ;;  %v235_v28 = vrot.slane %v192_v19, 4  ;;  %v361_v29 = vrot.slane %v328_v20, 4  ;;  %v227_v33 = vrot.slane %v226_v13, 1  ;;  %s544_s11 = sshll.u32 %s719_s3, 4  ;;  %s545_s11 = int_to_ptr.vmem [resolvable:$true] %s544_s11 }
  0xc2   :  { %v359_v50 = vrot.slane %v358_v31, 1  ;;  %v388_v0 = vsel %vm251_vm7, %v348_v57, %v387_v7  ;;  %s665_s12 = scalar_lea.vmem %s545_s11, 128  ;;  %p670_p11 = scmp.lt.s32.totalorder %s545_s11, %s545_s11 }
  0xc3   :  { %v232_v34 = vadd.f32 %v231_v25, %v230_v14  ;;  %v322_v35 = vpop.permute.xlu1 %321  ;;  %v315_v36 = vpop.permute.xlu0 %314  ;;  %v236_v22 = vadd.f32 %v235_v28, %v192_v19  ;;  %v362_v37 = vadd.f32 %v361_v29, %v328_v20  ;;  %v228_v54 = vadd.f32 %v227_v33, %v226_v13  ;;  %p666_p10 = scmp.ne.s32.totalorder %s545_s11, %s665_s12  ;;  %p671_p12 = scmp.lt.s32.totalorder %s665_s12, %s665_s12 }
  0xc4   :  { %v330_v38 = vsel %vm127_vm10, %v322_v35, 0.0  ;;  %v329_v39 = vsel %vm126_vm8, %v315_v36, 0.0  ;;  %v360_v2 = vadd.f32 %v359_v50, %v358_v31  ;;  %v389_v13 = vsel %vm253_vm9, %v354_v60, %v388_v0 }
  0xc5   :  { %v233_v41 = vrot.slane %v232_v34, 1  ;;  %v373_v42 = vrot.slane %v330_v38, 4  ;;  %v367_v43 = vrot.slane %v329_v39, 4  ;;  %v237_v47 = vrot.slane %v236_v22, 2  ;;  %p672_p13 = por %p671_p12, %p670_p11 }
  0xc6   :  { %v363_v48 = vrot.slane %v362_v37, 2  ;;  %v258_v9 = vsel %vm257_vm12, %v228_v54, %v256_v6  ;;  %v390_v17 = vsel %vm255_vm11, %v360_v2, %v389_v13 }
  0xc7   :  { %v374_v51 = vadd.f32 %v373_v42, %v330_v38  ;;  %v368_v52 = vadd.f32 %v367_v43, %v329_v39  ;;  %v238_v55 = vadd.f32 %v237_v47, %v236_v22  ;;  %v234_v58 = vadd.f32 %v233_v41, %v232_v34  ;;  %p673_p0 = pnand %p672_p13, %p666_p10 }
  0xc8   :  { %v364_v56 = vadd.f32 %v363_v48, %v362_v37 }
  0xc9   :  { %v375_v32 = vrot.slane %v374_v51, 2  ;;  %v369_v59 = vrot.slane %v368_v52, 2  ;;  %v239_v61 = vrot.slane %v238_v55, 1  ;;  %v260_v12 = vsel %vm259_vm13, %v234_v58, %v258_v9 }
  0xca   :  { %v365_v62 = vrot.slane %v364_v56, 1 }
  0xcb   :  { %v376_v3 = vadd.f32 %v375_v32, %v374_v51  ;;  %v370_v4 = vadd.f32 %v369_v59, %v368_v52  ;;  %v240_v8 = vadd.f32 %v239_v61, %v238_v55 }
  0xcc   :  { %v366_v5 = vadd.f32 %v365_v62, %v364_v56 }
  0xcd   :  { %v377_v10 = vrot.slane %v376_v3, 1  ;;  %v371_v11 = vrot.slane %v370_v4, 1  ;;  %v262_v14 = vsel %vm261_vm14, %v240_v8, %v260_v12 }
  0xce   :  { %609 = vmatprep.mubr.f32.mxu0 %v262_v14  ;;  %v391_v19 = vsel %vm257_vm12, %v366_v5, %v390_v17 }
  0xcf   :  { %v378_v15 = vadd.f32 %v377_v10, %v376_v3  ;;  %v372_v16 = vadd.f32 %v371_v11, %v370_v4 }
  0xd0   :  { %v498_v20 = vpop.permute.xlu0 %497 }
  0xd1   :  { %v392_v21 = vsel %vm259_vm13, %v372_v16, %v391_v19  ;;  %vm499_vm15 = vcmp.eq.s32.totalorder %v498_v20, %v803_v1 }
  0xd2   :  { %v393_v23 = vsel %vm261_vm14, %v378_v15, %v392_v21  ;;  %v506_v24 = vsel %vm499_vm15, %v558_v18, 0.0 }
  0xd3   :  { %610 = vmatmul.mubr.f32.vlgmr.msra.gmra.mxu0 %v393_v23  ;;  %507 = vadd.xlane.f32.xlu1 %v506_v24 }
  0xe4   :  { %515 = vperm.xlu1 %623, %v797_v46  }
 0x15c   :  { %v508_v25 = vpop.xlane.xlu1 %507 }
 0x160   :  { %v516_v26 = vpop.permute.xlu1 %515 }
 0x161   :  { %v518_v27 = vmul.f32 %v558_v18, %v516_v26 }
 0x193   :  { %v611_v28 = vpop.f32.mrf.mxu0 }
 0x194   :  { %v519_v29 = vadd.f32 %v611_v28, %v518_v27 }
 0x195   :  { %v484_v30 = vpop.f32.mrf.mxu0 }
 0x196   :  { %v521_v31 = vmax.f32 %v519_v29, 0.0  ;;  %v509_v33 = vsel %vm499_vm15, %v484_v30, 0.0 }
 0x197   :  { %510 = vadd.xlane.f32.xlu0 %v509_v33 }
 0x198   :  { %522 = vst [vmem:[#allocation9] sm:$0xff] %v521_v31 }
 0x199   :  { %676 = shalt.err (!%p673_p0)
}
 0x19a   :  { %547 = dma.vmem_to_hbm [thread:$0]  %s545_s11, 128, %s883_s6, [#allocation10]   ;;  %vm523_vm0 = vcmp.eq.s32.totalorder %v803_v1, 0 }
 0x19b   :  { %s720_s15 = smov [#allocation8]  }
 0x19c   :  { %s534_s16 = sshll.u32 %s720_s15, 4  ;;  %s535_s16 = int_to_ptr.vmem [resolvable:$true] %s534_s16 }
 0x19d   :  { %s685_s17 = scalar_lea.vmem %s535_s16, 128  ;;  %p690_p2 = scmp.lt.s32.totalorder %s535_s16, %s535_s16 }
 0x19e   :  { %p686_p1 = scmp.ne.s32.totalorder %s535_s16, %s685_s17  ;;  %p691_p3 = scmp.lt.s32.totalorder %s685_s17, %s685_s17 }
 0x1a0   :  { %p692_p4 = por %p691_p3, %p690_p2 }
 0x1a2   :  { %p693_p5 = pnand %p692_p4, %p686_p1 }
 0x220   :  { %v511_v46 = vpop.xlane.xlu0 %510 }
 0x221   :  { %v512_v34 = vadd.f32 %v511_v46, %v508_v25 }
 0x223   :  { %v520_v35 = vmax.f32 %v512_v34, 0.0 }
 0x225   :  { %v526_v36 = vsel %vm523_vm0, %v520_v35, 0.0 }
 0x226   :  { %527 = vst [vmem:[#allocation8] sm:$0xff] %v526_v36 }
 0x227   :  { %696 = shalt.err (!%p693_p5)
}
 0x228   :  { %537 = dma.vmem_to_hbm [thread:$0]  %s535_s16, 128, %s882_s5, [#allocation5]  }
 0x229   :  { %709 = dma.done.wait [#allocation5], 128  }
 0x22a   :  { %710 = vsyncadd [#allocation5], 4294967168 }
 0x22b   :  { %711 = dma.done.wait [#allocation10], 128  }
 0x22c   :  { %712 = vsyncadd [#allocation10], 4294967168 }
 0x22d   :  { %554 = vsyncpa [#allocation4], 1 }
 0x22e   :  { %555 = vsyncpa [#allocation7], 1 }
 0x22f   :  { %556 = vsyncpa [#allocation5], 1 }
 0x230   :  { %557 = vsyncpa [#allocation10], 1 }

// kernel: tpu_custom_call.1
= control target key start
LH: loop header
LB: loop body
LE: loop exit
PB: predicated region body
PF: predicated region fallthrough
CT: control target
= control target key end

     0   :  { %12 = vsyncpa [#allocation4], 0  ;;  %s877_s0 = inlined_call_operand.vmem [shape: f32[8,2], index: 0, kind: input, shape index: {}]   ;;  %s878_s1 = inlined_call_operand.vmem [shape: s32[1,8,8], index: 1, kind: input, shape index: {}]   ;;  %s879_s2 = inlined_call_operand.hbm [shape: f32[2,1,8,8], index: 2, kind: input, shape index: {}]   ;;  %s880_s3 = inlined_call_operand.vmem [shape: f32[1,128], index: 3, kind: input, shape index: {}]   ;;  %s881_s4 = inlined_call_operand.hbm [shape: f32[128,128], index: 4, kind: input, shape index: {}]   ;;  %s882_s5 = inlined_call_operand.hbm [shape: f32[8,128], index: 5, kind: output, shape index: {0}]   ;;  %s883_s6 = inlined_call_operand.hbm [shape: f32[8,128], index: 6, kind: output, shape index: {1}]  }
   0x1   :  { %13 = vsyncpa [#allocation7], 0 }
   0x2   :  { %14 = vsyncpa [#allocation5], 0 }
   0x3   :  { %15 = vsyncpa [#allocation10], 0  ;;  %s713_s21 = smov [#allocation3]  }
   0x4   :  { %s25_s22 = sshll.u32 %s713_s21, 4  ;;  %s26_s22 = int_to_ptr.vmem [resolvable:$true] %s25_s22 }
   0x5   :  { %s633_s23 = scalar_lea.vmem %s26_s22, 256  ;;  %p638_p1 = scmp.lt.s32.totalorder %s26_s22, %s26_s22 }
   0x6   :  { %p634_p0 = scmp.ne.s32.totalorder %s26_s22, %s633_s23  ;;  %p639_p2 = scmp.lt.s32.totalorder %s633_s23, %s633_s23 }
   0x8   :  { %p640_p3 = por %p639_p2, %p638_p1 }
   0xa   :  { %p641_p4 = pnand %p640_p3, %p634_p0 }
   0xc   :  { %644 = shalt.err (!%p641_p4)
}
   0xd   :  { %s714_s24 = smov 128   ;;  %s715_s25 = smov 8  }
   0xe   :  { %31 = dma.hbm_to_vmem [thread:$0]  %s879_s2, 256, %s26_s22, [#allocation4], %s714_s24, %s714_s24, %s715_s25  }
   0xf   :  { %s716_s28 = smov [#allocation6]  }
  0x10   :  { %s39_s29 = sshll.u32 %s716_s28, 4  ;;  %s40_s29 = int_to_ptr.vmem [resolvable:$true] %s39_s29 }
  0x11   :  { %s653_s30 = scalar_lea.vmem %s40_s29, 2048  ;;  %p658_p6 = scmp.lt.s32.totalorder %s40_s29, %s40_s29 }
  0x12   :  { %p654_p5 = scmp.ne.s32.totalorder %s40_s29, %s653_s30  ;;  %p659_p7 = scmp.lt.s32.totalorder %s653_s30, %s653_s30 }
  0x14   :  { %p660_p8 = por %p659_p7, %p658_p6 }
  0x16   :  { %p661_p9 = pnand %p660_p8, %p654_p5 }
  0x18   :  { %664 = shalt.err (!%p661_p9)
}
  0x19   :  { %45 = dma.hbm_to_vmem [thread:$0]  %s881_s4, 2048, %s40_s29, [#allocation7], %s714_s24, %s714_s24, %s715_s25  }
  0x1a   :  { %705 = dma.done.wait [#allocation4], 256  }
  0x1b   :  { %706 = vsyncadd [#allocation4], 4294967040 }
  0x1c   :  { %707 = dma.done.wait [#allocation7], 2048  }
  0x1d   :  { %708 = vsyncadd [#allocation7], 4294965248  ;;  %v52_v0 = vlaneseq  ;;  %v717_v1 = vmov 0   ;;  %v766_v6 = vld [vmem:[%s878_s1] sm:$0xff]  ;;  %v776_v15 = vld [vmem:[#allocation3 + $0x8] sm:$0xff]  ;;  %v718_v55 = vmov 1  }
  0x1e   :  { %622 = vset.pattern.permute.xlu0 %v717_v1  ;;  %v768_v7 = vld [vmem:[#allocation3] sm:$0xff]  ;;  %v417_v21 = vld [vmem:[#allocation6 + $0x78] sm:$0xff]  ;;  %v415_v26 = vld [vmem:[#allocation6 + $0x68] sm:$0xff]  ;;  %623 = vset.pattern.permute.xlu1 %v718_v55  ;;  %vm249_vm5 = vcmask 1041409   ;;  %vm251_vm7 = vcmask 1042434   ;;  %vm253_vm9 = vcmask 1043459  }
  0x1f   :  { %v65_v2 = vshrl.u32 %v52_v0, 7  ;;  %577 = vmatprep.subr.mxu0 %v417_v21  ;;  %v416_v25 = vld [vmem:[#allocation6 + $0x70] sm:$0xff]  ;;  %v414_v30 = vld [vmem:[#allocation6 + $0x60] sm:$0xff]  ;;  %v413_v31 = vld [vmem:[#allocation6 + $0x58] sm:$0xff]  ;;  %v803_v1 = vand.u32 127, %v52_v0  ;;  %vm255_vm11 = vcmask 1044484  }
  0x20   :  { %578 = vmatpush3.msra.mxu0 %v417_v21  ;;  %v412_v34 = vld [vmem:[#allocation6 + $0x50] sm:$0xff]  ;;  %v411_v38 = vld [vmem:[#allocation6 + $0x48] sm:$0xff]  ;;  %v410_v39 = vld [vmem:[#allocation6 + $0x40] sm:$0xff]  ;;  %vm257_vm12 = vcmask 1045509   ;;  %vm259_vm13 = vcmask 1046534   ;;  %vm261_vm14 = vcmask 1047559  }
  0x21   :  { %v80_v3 = vsub.s32 2, %v65_v2  ;;  %v66_v4 = vsub.s32 0, %v65_v2  ;;  %v73_v5 = vsub.s32 1, %v65_v2  ;;  %v87_v12 = vsub.s32 3, %v65_v2  ;;  %579 = vmatprep.subr.mxu0 %v416_v25  ;;  %v409_v42 = vld [vmem:[#allocation6 + $0x38] sm:$0xff]  ;;  %v408_v45 = vld [vmem:[#allocation6 + $0x30] sm:$0xff] }
  0x22   :  { %v94_v18 = vsub.s32 4, %v65_v2  ;;  %v101_v24 = vsub.s32 5, %v65_v2  ;;  %580 = vmatpush3.msra.mxu0 %v416_v25  ;;  %v108_v29 = vsub.s32 6, %v65_v2  ;;  %v115_v37 = vsub.s32 7, %v65_v2  ;;  %v797_v46 = vld [vmem:[%s877_s0] sm:$0xff]  ;;  %v407_v47 = vld [vmem:[#allocation6 + $0x28] sm:$0xff] }
  0x23   :  { %v81_v8 = vrot.slane %v766_v6, %v80_v3  ;;  %v67_v9 = vrot.slane %v766_v6, %v66_v4  ;;  %v132_v10 = vrot.slane %v768_v7, %v66_v4  ;;  %v74_v11 = vrot.slane %v766_v6, %v73_v5  ;;  %581 = vmatprep.subr.mxu0 %v415_v26  ;;  %v406_v51 = vld [vmem:[#allocation6 + $0x20] sm:$0xff]  ;;  %v405_v53 = vld [vmem:[#allocation6 + $0x18] sm:$0xff]  ;;  %v404_v54 = vld [vmem:[#allocation6 + $0x10] sm:$0xff] }
  0x24   :  { %v88_v13 = vrot.slane %v766_v6, %v87_v12  ;;  %v139_v14 = vrot.slane %v768_v7, %v73_v5  ;;  %v270_v16 = vrot.slane %v776_v15, %v66_v4  ;;  %v146_v17 = vrot.slane %v768_v7, %v80_v3  ;;  %582 = vmatpush3.msra.mxu0 %v415_v26  ;;  %v403_v56 = vld [vmem:[#allocation6 + $0x8] sm:$0xff]  ;;  %v402_v57 = vld [vmem:[#allocation6] sm:$0xff] }
  0x25   :  { %83 = vbcast.lane.b32.xlu1 %v81_v8, 256  ;;  %69 = vbcast.lane.b32.xlu0 %v67_v9, 256  ;;  %v95_v19 = vrot.slane %v766_v6, %v94_v18  ;;  %v277_v20 = vrot.slane %v776_v15, %v73_v5  ;;  %v284_v22 = vrot.slane %v776_v15, %v80_v3  ;;  %v612_v50 = vtrunc.f32 %v797_v46 }
  0x26   :  { %v153_v23 = vrot.slane %v768_v7, %v87_v12  ;;  %v160_v27 = vrot.slane %v768_v7, %v94_v18  ;;  %v102_v28 = vrot.slane %v766_v6, %v101_v24  ;;  %583 = vmatprep.subr.mxu0 %v414_v30  ;;  %v109_v32 = vrot.slane %v766_v6, %v108_v29 }
  0x27   :  { %v291_v33 = vrot.slane %v776_v15, %v87_v12  ;;  %584 = vmatpush3.msra.mxu0 %v414_v30  ;;  %v298_v35 = vrot.slane %v776_v15, %v94_v18  ;;  %v167_v36 = vrot.slane %v768_v7, %v101_v24  ;;  %v174_v40 = vrot.slane %v768_v7, %v108_v29 }
  0x28   :  { %585 = vmatprep.subr.mxu0 %v413_v31  ;;  %v116_v41 = vrot.slane %v766_v6, %v115_v37  ;;  %v181_v43 = vrot.slane %v768_v7, %v115_v37  ;;  %v305_v44 = vrot.slane %v776_v15, %v101_v24  ;;  %v319_v48 = vrot.slane %v776_v15, %v115_v37 }
  0x29   :  { %134 = vbcast.lane.b32.xlu1 %v132_v10, 256  ;;  %76 = vbcast.lane.b32.xlu0 %v74_v11, 256  ;;  %v312_v49 = vrot.slane %v776_v15, %v108_v29  ;;  %v613_v52 = vcvt.f32.s32 %v612_v50 }
  0x2a   :  { %586 = vmatpush3.msra.mxu0 %v413_v31 }
  0x2b   :  { %587 = vmatprep.subr.mxu0 %v412_v34 }
  0x2c   :  { %588 = vmatpush3.msra.mxu0 %v412_v34 }
  0x2d   :  { %90 = vbcast.lane.b32.xlu1 %v88_v13, 256  ;;  %141 = vbcast.lane.b32.xlu0 %v139_v14, 256 }
  0x2e   :  { %589 = vmatprep.subr.mxu0 %v411_v38 }
  0x2f   :  { %590 = vmatpush3.msra.mxu0 %v411_v38 }
  0x30   :  { %591 = vmatprep.subr.mxu0 %v410_v39 }
  0x31   :  { %272 = vbcast.lane.b32.xlu1 %v270_v16, 256  ;;  %148 = vbcast.lane.b32.xlu0 %v146_v17, 256 }
  0x32   :  { %592 = vmatpush3.msra.mxu0 %v410_v39 }
  0x33   :  { %593 = vmatprep.subr.mxu0 %v409_v42 }
  0x34   :  { %594 = vmatpush3.msra.mxu0 %v409_v42 }
  0x35   :  { %97 = vbcast.lane.b32.xlu1 %v95_v19, 256  ;;  %279 = vbcast.lane.b32.xlu0 %v277_v20, 256 }
  0x36   :  { %595 = vmatprep.subr.mxu0 %v408_v45 }
  0x37   :  { %596 = vmatpush3.msra.mxu0 %v408_v45 }
  0x38   :  { %597 = vmatprep.subr.mxu0 %v407_v47 }
  0x39   :  { %286 = vbcast.lane.b32.xlu1 %v284_v22, 256  ;;  %155 = vbcast.lane.b32.xlu0 %v153_v23, 256 }
  0x3a   :  { %598 = vmatpush3.msra.mxu0 %v407_v47 }
  0x3b   :  { %599 = vmatprep.subr.mxu0 %v406_v51 }
  0x3c   :  { %600 = vmatpush3.msra.mxu0 %v406_v51 }
  0x3d   :  { %162 = vbcast.lane.b32.xlu1 %v160_v27, 256  ;;  %104 = vbcast.lane.b32.xlu0 %v102_v28, 256 }
  0x3e   :  { %601 = vmatprep.subr.mxu0 %v405_v53 }
  0x3f   :  { %602 = vmatpush3.msra.mxu0 %v405_v53 }
  0x40   :  { %603 = vmatprep.subr.mxu0 %v404_v54 }
  0x41   :  { %111 = vbcast.lane.b32.xlu1 %v109_v32, 256  ;;  %293 = vbcast.lane.b32.xlu0 %v291_v33, 256 }
  0x42   :  { %604 = vmatpush3.msra.mxu0 %v404_v54 }
  0x43   :  { %605 = vmatprep.subr.mxu0 %v403_v56 }
  0x44   :  { %606 = vmatpush3.msra.mxu0 %v403_v56 }
  0x45   :  { %300 = vbcast.lane.b32.xlu1 %v298_v35, 256  ;;  %169 = vbcast.lane.b32.xlu0 %v167_v36, 256 }
  0x46   :  { %607 = vmatprep.subr.mxu0 %v402_v57 }
  0x47   :  { %608 = vmatpush3.msra.mxu0 %v402_v57 }
  0x49   :  { %176 = vbcast.lane.b32.xlu1 %v174_v40, 256  ;;  %118 = vbcast.lane.b32.xlu0 %v116_v41, 256 }
  0x4d   :  { %183 = vbcast.lane.b32.xlu1 %v181_v43, 256  ;;  %307 = vbcast.lane.b32.xlu0 %v305_v44, 256 }
  0x51   :  { %321 = vbcast.lane.b32.xlu1 %v319_v48, 256  ;;  %314 = vbcast.lane.b32.xlu0 %v312_v49, 256 }
  0x55   :  { %497 = vperm.xlu0 %622, %v613_v52  }
  0x59   :  { %624 = vset.pattern.permute.xlu0 %v718_v55 }
  0x97   :  { %v84_v58 = vpop.permute.xlu1 %83  ;;  %v70_v59 = vpop.permute.xlu0 %69 }
  0x98   :  { %vm122_vm1 = vcmp.eq.s32.totalorder %v84_v58, %v803_v1  ;;  %vm120_vm2 = vcmp.eq.s32.totalorder %v70_v59, %v803_v1 }
  0x9b   :  { %v135_v60 = vpop.permute.xlu1 %134  ;;  %v77_v61 = vpop.permute.xlu0 %76 }
  0x9c   :  { %vm121_vm0 = vcmp.eq.s32.totalorder %v77_v61, %v803_v1  ;;  %v185_v6 = vsel %vm120_vm2, %v135_v60, 0.0 }
  0x9d   :  { %v193_v11 = vrot.slane %v185_v6, 4 }
  0x9f   :  { %v91_v62 = vpop.permute.xlu1 %90  ;;  %v142_v63 = vpop.permute.xlu0 %141  ;;  %v194_v17 = vadd.f32 %v193_v11, %v185_v6 }
  0xa0   :  { %v186_v4 = vsel %vm121_vm0, %v142_v63, 0.0  ;;  %vm123_vm3 = vcmp.eq.s32.totalorder %v91_v62, %v803_v1 }
  0xa1   :  { %v199_v7 = vrot.slane %v186_v4, 4  ;;  %v195_v27 = vrot.slane %v194_v17, 2 }
  0xa3   :  { %v273_v2 = vpop.permute.xlu1 %272  ;;  %v149_v3 = vpop.permute.xlu0 %148  ;;  %v200_v12 = vadd.f32 %v199_v7, %v186_v4  ;;  %v196_v39 = vadd.f32 %v195_v27, %v194_v17 }
  0xa4   :  { %v187_v5 = vsel %vm122_vm1, %v149_v3, 0.0  ;;  %v323_v10 = vsel %vm120_vm2, %v273_v2, 0.0 }
  0xa5   :  { %v205_v0 = vrot.slane %v187_v5, 4  ;;  %v331_v15 = vrot.slane %v323_v10, 4  ;;  %v201_v19 = vrot.slane %v200_v12, 2  ;;  %v197_v55 = vrot.slane %v196_v39, 1 }
  0xa7   :  { %v98_v8 = vpop.permute.xlu1 %97  ;;  %v280_v9 = vpop.permute.xlu0 %279  ;;  %v206_v16 = vadd.f32 %v205_v0, %v187_v5  ;;  %v332_v23 = vadd.f32 %v331_v15, %v323_v10  ;;  %v202_v31 = vadd.f32 %v201_v19, %v200_v12 }
  0xa8   :  { %v324_v18 = vsel %vm121_vm0, %v280_v9, 0.0  ;;  %vm124_vm4 = vcmp.eq.s32.totalorder %v98_v8, %v803_v1  ;;  %v198_v9 = vadd.f32 %v197_v55, %v196_v39 }
  0xa9   :  { %v207_v24 = vrot.slane %v206_v16, 2  ;;  %v337_v26 = vrot.slane %v324_v18, 4  ;;  %v333_v34 = vrot.slane %v332_v23, 2  ;;  %v203_v43 = vrot.slane %v202_v31, 1 }
  0xab   :  { %v287_v13 = vpop.permute.xlu1 %286  ;;  %v156_v14 = vpop.permute.xlu0 %155  ;;  %v208_v35 = vadd.f32 %v207_v24, %v206_v16  ;;  %v338_v37 = vadd.f32 %v337_v26, %v324_v18  ;;  %v334_v47 = vadd.f32 %v333_v34, %v332_v23  ;;  %v204_v63 = vadd.f32 %v203_v43, %v202_v31 }
  0xac   :  { %v188_v20 = vsel %vm123_vm3, %v156_v14, 0.0  ;;  %v325_v28 = vsel %vm122_vm1, %v287_v13, 0.0 }
  0xad   :  { %v211_v29 = vrot.slane %v188_v20, 4  ;;  %v343_v38 = vrot.slane %v325_v28, 4  ;;  %v209_v48 = vrot.slane %v208_v35, 1  ;;  %v339_v51 = vrot.slane %v338_v37, 2 }
  0xae   :  { %v335_v2 = vrot.slane %v334_v47, 1  ;;  %v250_v17 = vsel %vm249_vm5, %v204_v63, %v198_v9 }
  0xaf   :  { %v163_v21 = vpop.permute.xlu1 %162  ;;  %v818_v22 = vpop.permute.xlu0 %104  ;;  %v212_v40 = vadd.f32 %v211_v29, %v188_v20  ;;  %v344_v52 = vadd.f32 %v343_v38, %v325_v28  ;;  %v210_v3 = vadd.f32 %v209_v48, %v208_v35  ;;  %v340_v5 = vadd.f32 %v339_v51, %v338_v37 }
  0xb0   :  { %v189_v25 = vsel %vm124_vm4, %v163_v21, 0.0  ;;  %vm125_vm6 = vcmp.eq.s32.totalorder %v818_v22, %v803_v1  ;;  %v336_v18 = vadd.f32 %v335_v2, %v334_v47 }
  0xb1   :  { %v217_v30 = vrot.slane %v189_v25, 4  ;;  %v213_v56 = vrot.slane %v212_v40, 2  ;;  %v345_v6 = vrot.slane %v344_v52, 2  ;;  %v252_v21 = vsel %vm251_vm7, %v210_v3, %v250_v17 }
  0xb2   :  { %v341_v23 = vrot.slane %v340_v5, 1 }
  0xb3   :  { %v824_v32 = vpop.permute.xlu1 %111  ;;  %v294_v33 = vpop.permute.xlu0 %293  ;;  %v218_v41 = vadd.f32 %v217_v30, %v189_v25  ;;  %v214_v0 = vadd.f32 %v213_v56, %v212_v40  ;;  %v346_v24 = vadd.f32 %v345_v6, %v344_v52 }
  0xb4   :  { %v326_v36 = vsel %vm123_vm3, %v294_v33, 0.0  ;;  %vm126_vm8 = vcmp.eq.s32.totalorder %v824_v32, %v803_v1 }
  0xb5   :  { %v349_v42 = vrot.slane %v326_v36, 4  ;;  %v219_v57 = vrot.slane %v218_v41, 2  ;;  %v215_v26 = vrot.slane %v214_v0, 1  ;;  %v347_v40 = vrot.slane %v346_v24, 1 }
  0xb7   :  { %v301_v44 = vpop.permute.xlu1 %300  ;;  %v170_v45 = vpop.permute.xlu0 %169  ;;  %v350_v58 = vadd.f32 %v349_v42, %v326_v36  ;;  %v220_v10 = vadd.f32 %v219_v57, %v218_v41  ;;  %v348_v57 = vadd.f32 %v347_v40, %v346_v24 }
  0xb8   :  { %v327_v49 = vsel %vm124_vm4, %v301_v44, 0.0  ;;  %v190_v50 = vsel %vm125_vm6, %v170_v45, 0.0  ;;  %v216_v44 = vadd.f32 %v215_v26, %v214_v0 }
  0xb9   :  { %v355_v53 = vrot.slane %v327_v49, 4  ;;  %v223_v54 = vrot.slane %v190_v50, 4  ;;  %v351_v11 = vrot.slane %v350_v58, 2  ;;  %v221_v30 = vrot.slane %v220_v10, 1 }
  0xba   :  { %v254_v63 = vsel %vm253_vm9, %v216_v44, %v252_v21 }
  0xbb   :  { %v356_v59 = vadd.f32 %v355_v53, %v327_v49  ;;  %v224_v60 = vadd.f32 %v223_v54, %v190_v50  ;;  %v177_v61 = vpop.permute.xlu1 %176  ;;  %v119_v62 = vpop.permute.xlu0 %118  ;;  %v352_v27 = vadd.f32 %v351_v11, %v350_v58  ;;  %v222_v49 = vadd.f32 %v221_v30, %v220_v10 }
  0xbc   :  { %v191_v4 = vsel %vm126_vm8, %v177_v61, 0.0  ;;  %vm127_vm10 = vcmp.eq.s32.totalorder %v119_v62, %v803_v1  ;;  %v342_v53 = vadd.f32 %v341_v23, %v340_v5 }
  0xbd   :  { %v225_v7 = vrot.slane %v224_v60, 2  ;;  %v229_v8 = vrot.slane %v191_v4, 4  ;;  %v357_v12 = vrot.slane %v356_v59, 2  ;;  %v353_v45 = vrot.slane %v352_v27, 1 }
  0xbe   :  { %v256_v6 = vsel %vm255_vm11, %v222_v49, %v254_v63 }
  0xbf   :  { %v226_v13 = vadd.f32 %v225_v7, %v224_v60  ;;  %v230_v14 = vadd.f32 %v229_v8, %v191_v4  ;;  %v184_v15 = vpop.permute.xlu1 %183  ;;  %v308_v16 = vpop.permute.xlu0 %307  ;;  %v358_v31 = vadd.f32 %v357_v12, %v356_v59  ;;  %v354_v60 = vadd.f32 %v353_v45, %v352_v27 }
  0xc0   :  { %v192_v19 = vsel %vm127_vm10, %v184_v15, 0.0  ;;  %v328_v20 = vsel %vm125_vm6, %v308_v16, 0.0  ;;  %v387_v7 = vsel %vm249_vm5, %v342_v53, %v336_v18  ;;  %v558_v18 = vld [vmem:[%s880_s3] ss:$0 sm:$0xff]  ;;  %s719_s3 = smov [#allocation9]  }
  0xc1   :  { %v231_v25 = vrot.slane %v230_v14, 2  ;;  %v235_v28 = vrot.slane %v192_v19, 4  ;;  %v361_v29 = vrot.slane %v328_v20, 4  ;;  %v227_v33 = vrot.slane %v226_v13, 1  ;;  %s544_s11 = sshll.u32 %s719_s3, 4  ;;  %s545_s11 = int_to_ptr.vmem [resolvable:$true] %s544_s11 }
  0xc2   :  { %v359_v50 = vrot.slane %v358_v31, 1  ;;  %v388_v0 = vsel %vm251_vm7, %v348_v57, %v387_v7  ;;  %s665_s12 = scalar_lea.vmem %s545_s11, 128  ;;  %p670_p11 = scmp.lt.s32.totalorder %s545_s11, %s545_s11 }
  0xc3   :  { %v232_v34 = vadd.f32 %v231_v25, %v230_v14  ;;  %v322_v35 = vpop.permute.xlu1 %321  ;;  %v315_v36 = vpop.permute.xlu0 %314  ;;  %v236_v22 = vadd.f32 %v235_v28, %v192_v19  ;;  %v362_v37 = vadd.f32 %v361_v29, %v328_v20  ;;  %v228_v54 = vadd.f32 %v227_v33, %v226_v13  ;;  %p666_p10 = scmp.ne.s32.totalorder %s545_s11, %s665_s12  ;;  %p671_p12 = scmp.lt.s32.totalorder %s665_s12, %s665_s12 }
  0xc4   :  { %v330_v38 = vsel %vm127_vm10, %v322_v35, 0.0  ;;  %v329_v39 = vsel %vm126_vm8, %v315_v36, 0.0  ;;  %v360_v2 = vadd.f32 %v359_v50, %v358_v31  ;;  %v389_v13 = vsel %vm253_vm9, %v354_v60, %v388_v0 }
  0xc5   :  { %v233_v41 = vrot.slane %v232_v34, 1  ;;  %v373_v42 = vrot.slane %v330_v38, 4  ;;  %v367_v43 = vrot.slane %v329_v39, 4  ;;  %v237_v47 = vrot.slane %v236_v22, 2  ;;  %p672_p13 = por %p671_p12, %p670_p11 }
  0xc6   :  { %v363_v48 = vrot.slane %v362_v37, 2  ;;  %v258_v9 = vsel %vm257_vm12, %v228_v54, %v256_v6  ;;  %v390_v17 = vsel %vm255_vm11, %v360_v2, %v389_v13 }
  0xc7   :  { %v374_v51 = vadd.f32 %v373_v42, %v330_v38  ;;  %v368_v52 = vadd.f32 %v367_v43, %v329_v39  ;;  %v238_v55 = vadd.f32 %v237_v47, %v236_v22  ;;  %v234_v58 = vadd.f32 %v233_v41, %v232_v34  ;;  %p673_p0 = pnand %p672_p13, %p666_p10 }
  0xc8   :  { %v364_v56 = vadd.f32 %v363_v48, %v362_v37 }
  0xc9   :  { %v375_v32 = vrot.slane %v374_v51, 2  ;;  %v369_v59 = vrot.slane %v368_v52, 2  ;;  %v239_v61 = vrot.slane %v238_v55, 1  ;;  %v260_v12 = vsel %vm259_vm13, %v234_v58, %v258_v9 }
  0xca   :  { %v365_v62 = vrot.slane %v364_v56, 1 }
  0xcb   :  { %v376_v3 = vadd.f32 %v375_v32, %v374_v51  ;;  %v370_v4 = vadd.f32 %v369_v59, %v368_v52  ;;  %v240_v8 = vadd.f32 %v239_v61, %v238_v55 }
  0xcc   :  { %v366_v5 = vadd.f32 %v365_v62, %v364_v56 }
  0xcd   :  { %v377_v10 = vrot.slane %v376_v3, 1  ;;  %v371_v11 = vrot.slane %v370_v4, 1  ;;  %v262_v14 = vsel %vm261_vm14, %v240_v8, %v260_v12 }
  0xce   :  { %609 = vmatprep.mubr.f32.mxu0 %v262_v14  ;;  %v391_v19 = vsel %vm257_vm12, %v366_v5, %v390_v17 }
  0xcf   :  { %v378_v15 = vadd.f32 %v377_v10, %v376_v3  ;;  %v372_v16 = vadd.f32 %v371_v11, %v370_v4 }
  0xd0   :  { %v498_v20 = vpop.permute.xlu0 %497 }
  0xd1   :  { %v392_v21 = vsel %vm259_vm13, %v372_v16, %v391_v19  ;;  %vm499_vm15 = vcmp.eq.s32.totalorder %v498_v20, %v803_v1 }
  0xd2   :  { %v393_v23 = vsel %vm261_vm14, %v378_v15, %v392_v21  ;;  %v506_v24 = vsel %vm499_vm15, %v558_v18, 0.0 }
  0xd3   :  { %610 = vmatmul.mubr.f32.vlgmr.msra.gmra.mxu0 %v393_v23  ;;  %507 = vadd.xlane.f32.xlu1 %v506_v24 }
  0xe4   :  { %515 = vperm.xlu1 %623, %v797_v46  }
 0x15c   :  { %v508_v25 = vpop.xlane.xlu1 %507 }
 0x160   :  { %v516_v26 = vpop.permute.xlu1 %515 }
 0x161   :  { %v518_v27 = vmul.f32 %v558_v18, %v516_v26 }
 0x193   :  { %v611_v28 = vpop.f32.mrf.mxu0 }
 0x194   :  { %v519_v29 = vadd.f32 %v611_v28, %v518_v27 }
 0x195   :  { %v484_v30 = vpop.f32.mrf.mxu0 }
 0x196   :  { %v521_v31 = vmax.f32 %v519_v29, 0.0  ;;  %v509_v33 = vsel %vm499_vm15, %v484_v30, 0.0 }
 0x197   :  { %510 = vadd.xlane.f32.xlu0 %v509_v33 }
 0x198   :  { %522 = vst [vmem:[#allocation9] sm:$0xff] %v521_v31 }
 0x199   :  { %676 = shalt.err (!%p673_p0)
}
 0x19a   :  { %547 = dma.vmem_to_hbm [thread:$0]  %s545_s11, 128, %s883_s6, [#allocation10]   ;;  %vm523_vm0 = vcmp.eq.s32.totalorder %v803_v1, 0 }
 0x19b   :  { %s720_s15 = smov [#allocation8]  }
 0x19c   :  { %s534_s16 = sshll.u32 %s720_s15, 4  ;;  %s535_s16 = int_to_ptr.vmem [resolvable:$true] %s534_s16 }
 0x19d   :  { %s685_s17 = scalar_lea.vmem %s535_s16, 128  ;;  %p690_p2 = scmp.lt.s32.totalorder %s535_s16, %s535_s16 }
 0x19e   :  { %p686_p1 = scmp.ne.s32.totalorder %s535_s16, %s685_s17  ;;  %p691_p3 = scmp.lt.s32.totalorder %s685_s17, %s685_s17 }
 0x1a0   :  { %p692_p4 = por %p691_p3, %p690_p2 }
 0x1a2   :  { %p693_p5 = pnand %p692_p4, %p686_p1 }
 0x220   :  { %v511_v46 = vpop.xlane.xlu0 %510 }
 0x221   :  { %v512_v34 = vadd.f32 %v511_v46, %v508_v25 }
 0x223   :  { %v520_v35 = vmax.f32 %v512_v34, 0.0 }
 0x225   :  { %v526_v36 = vsel %vm523_vm0, %v520_v35, 0.0 }
 0x226   :  { %527 = vst [vmem:[#allocation8] sm:$0xff] %v526_v36 }
 0x227   :  { %696 = shalt.err (!%p693_p5)
}
 0x228   :  { %537 = dma.vmem_to_hbm [thread:$0]  %s535_s16, 128, %s882_s5, [#allocation5]  }
 0x229   :  { %709 = dma.done.wait [#allocation5], 128  }
 0x22a   :  { %710 = vsyncadd [#allocation5], 4294967168 }
 0x22b   :  { %711 = dma.done.wait [#allocation10], 128  }
 0x22c   :  { %712 = vsyncadd [#allocation10], 4294967168 }
 0x22d   :  { %554 = vsyncpa [#allocation4], 1 }
 0x22e   :  { %555 = vsyncpa [#allocation7], 1 }
 0x22f   :  { %556 = vsyncpa [#allocation5], 1 }
 0x230   :  { %557 = vsyncpa [#allocation10], 1 }

</bundles_post_ra>
